<compile_context>
chip_gen: v7x
topology: tpu7x:2x2x1
jax: 0.10.0
libtpu: 0.0.40
codegen_flags: <defaults>
</compile_context>

<pallas_src>
import functools

import jax
import jax.numpy as jnp
from jax.experimental import pallas as pl
from jax.experimental.pallas import tpu as pltpu


# --------------------------- conv3x3x3 + BN kernel ---------------------------

def _conv3d_bn_kernel(x_ref, w_ref, b_ref, *outs, apply_relu, emit_pool, H, W):
    # x_ref: (H+2, W+2, C) halo plane at padded depth d + kd
    # w_ref: (9, C, Cout) bf16 weights for this depth tap (BN scale folded in)
    # b_ref: (1, Cout) folded BN bias
    if emit_pool:
        o_ref, pool_ref, acc_ref = outs
    else:
        o_ref, acc_ref = outs
        pool_ref = None
    C = x_ref.shape[-1]
    kd = pl.program_id(2)

    @pl.when(kd == 0)
    def _init():
        acc_ref[...] = jnp.zeros_like(acc_ref)

    # in-VMEM "im2col": 9 in-plane taps, each a small MXU matmul, accumulated in f32
    psum = None
    for t in range(9):
        kh, kw = t // 3, t % 3
        tap = x_ref[kh:kh + H, kw:kw + W, :].reshape(H * W, C).astype(jnp.bfloat16)
        m = jnp.dot(tap, w_ref[t], preferred_element_type=jnp.float32)
        psum = m if psum is None else psum + m
    acc_ref[...] += psum

    @pl.when(kd == 2)
    def _finalize():
        y = acc_ref[...] + b_ref[...]          # BN scale pre-folded into weights
        if apply_relu:
            y = jnp.maximum(y, 0.0)
        o_ref[...] = y.astype(o_ref.dtype)
        if emit_pool:                          # DepthAttention avg-pool over H, W
            pool_ref[...] = jnp.mean(y, axis=0, keepdims=True)


def conv3x3x3_bn(x, w_folded, bias, *, relu, emit_pool, out_dtype):
    """3x3x3 conv (stride 1, pad 1) with folded eval-mode BN (+ReLU / +HW-mean)."""
    N, D, H, W, C = x.shape
    Cout = w_folded.shape[-1]
    # zero-pad D,H,W by 1; bf16 halves the halo DMA traffic (MXU runs bf16 anyway)
    xp = jnp.pad(x.astype(jnp.bfloat16), ((0, 0), (1, 1), (1, 1), (1, 1), (0, 0)))

    out_spec = pl.BlockSpec((None, None, H * W, Cout), lambda n, d, k: (n, d, 0, 0))
    if emit_pool:
        out_shape = (jax.ShapeDtypeStruct((N, D, H * W, Cout), out_dtype),
                     jax.ShapeDtypeStruct((N, D, 1, Cout), jnp.float32))
        out_specs = (out_spec,
                     pl.BlockSpec((None, None, 1, Cout), lambda n, d, k: (n, d, 0, 0)))
    else:
        out_shape = jax.ShapeDtypeStruct((N, D, H * W, Cout), out_dtype)
        out_specs = out_spec

    flops = 2 * N * D * H * W * 27 * C * Cout
    bytes_accessed = (3 * xp.size * xp.dtype.itemsize                 # halo re-read per kd
                      + N * D * w_folded.size * w_folded.dtype.itemsize
                      + N * D * H * W * Cout * jnp.dtype(out_dtype).itemsize)

    return pl.pallas_call(
        functools.partial(_conv3d_bn_kernel, apply_relu=relu,
                          emit_pool=emit_pool, H=H, W=W),
        out_shape=out_shape,
        grid=(N, D, 3),
        in_specs=[
            # halo plane at padded depth d + kd (block size 1 along D => element index)
            pl.BlockSpec((None, None, H + 2, W + 2, C),
                         lambda n, d, k: (n, d + k, 0, 0, 0)),
            # per-depth-tap weights, resident-ish (tiny), indexed by kd
            pl.BlockSpec((None, 9, C, Cout), lambda n, d, k: (k, 0, 0, 0)),
            pl.BlockSpec((1, Cout), lambda n, d, k: (0, 0)),
        ],
        out_specs=out_specs,
        scratch_shapes=[pltpu.VMEM((H * W, Cout), jnp.float32)],
        compiler_params=pltpu.CompilerParams(
            dimension_semantics=("parallel", "parallel", "arbitrary"),
            vmem_limit_bytes=32 * 1024 * 1024),
        cost_estimate=pl.CostEstimate(flops=flops, transcendentals=0,
                                      bytes_accessed=bytes_accessed),
    )(xp, w_folded, bias)


# ------------------- scale * x + residual -> ReLU (lane-dense) -------------------

def _apply_kernel(v_ref, r_ref, s_ref, o_ref):
    # v_ref/r_ref: (TD, H, W*C); s_ref: (TD, W*C) broadcast over H
    y = v_ref[...] * s_ref[...][:, None, :] + r_ref[...]
    o_ref[...] = jnp.maximum(y, 0.0)


def apply_scale_residual_relu(v, res, scale):
    """out = relu(v * scale + res); last dim is the lane-dense W*C fold."""
    N, D, H, WC = v.shape
    td = 8 if D % 8 == 0 else D            # depth tile: multiple of 8 or full D
    return pl.pallas_call(
        _apply_kernel,
        out_shape=jax.ShapeDtypeStruct((N, D, H, WC), jnp.float32),
        grid=(N, D // td),
        in_specs=[
            pl.BlockSpec((None, td, H, WC), lambda n, t: (n, t, 0, 0)),
            pl.BlockSpec((None, td, H, WC), lambda n, t: (n, t, 0, 0)),
            pl.BlockSpec((None, td, WC), lambda n, t: (n, t, 0)),
        ],
        out_specs=pl.BlockSpec((None, td, H, WC), lambda n, t: (n, t, 0, 0)),
        compiler_params=pltpu.CompilerParams(
            dimension_semantics=("parallel", "parallel"),
            vmem_limit_bytes=32 * 1024 * 1024),
    )(v, res, scale)


# ------------------------------ JAX glue ------------------------------

def _fold_conv_bn(w, gamma, beta, mean, var, eps=1e-5):
    """Fold eval-mode BatchNorm3d into the conv.  Returns bf16 weights laid out as
    (kD, kH*kW, Cin, Cout) with the BN scale folded in, plus an f32 (1, Cout) bias."""
    scale = gamma / jnp.sqrt(var + eps)                       # (Cout,)
    bias = (beta - mean * scale)[None, :].astype(jnp.float32)
    wt = jnp.transpose(w, (2, 3, 4, 1, 0)) * scale            # (3,3,3,Cin,Cout)
    Cout, Cin = w.shape[0], w.shape[1]
    return wt.reshape(3, 9, Cin, Cout).astype(jnp.bfloat16), bias


def dase_basic_block(x, params):
    """x: (N, D, H, W, C) float32 -- NDHWC view of the PyTorch NCDHW input."""
    N, D, H, W, C = x.shape
    depth = params["da_w2"].shape[0] // C
    assert D == depth, "input depth must equal the DepthAttention `depth`"

    w1, b1 = _fold_conv_bn(params["w1"], *params["bn1"])
    w2, b2 = _fold_conv_bn(params["w2"], *params["bn2"])

    # conv1 -> bn1 -> relu   (bf16 output: halves HBM traffic into conv2)
    h1 = conv3x3x3_bn(x, w1, b1, relu=True, emit_pool=False, out_dtype=jnp.bfloat16)
    h1 = h1.reshape(N, D, H, W, C)

    # conv2 -> bn2, with DepthAttention's mean-over-(H,W) fused into the epilogue
    h2, da_pool = conv3x3x3_bn(h1, w2, b2, relu=False, emit_pool=True,
                               out_dtype=jnp.float32)
    da_pool = da_pool[:, :, 0, :]                                 # (N, D, C)

    # ---- tiny FC heads: plain JAX glue (negligible work) ----
    # DepthAttention: PyTorch flattens the pooled (b, c, d) tensor as c*D + d.
    da_y = jnp.transpose(da_pool, (0, 2, 1)).reshape(N, C * D)
    da_h = jax.nn.relu(da_y @ params["da_w1"].T + params["da_b1"])
    da_s = jax.nn.sigmoid(da_h @ params["da_w2"].T + params["da_b2"])
    da_scale = jnp.transpose(da_s.reshape(N, C, D), (0, 2, 1))    # (N, D, C)

    # SELayer pools the DepthAttention-scaled tensor (PyTorch order: se(da(bn2(out))))
    se_y = jnp.mean(da_pool * da_scale, axis=1)                   # (N, C)
    se_h = jax.nn.relu(se_y @ params["se_w1"].T + params["se_b1"])
    se_s = jax.nn.sigmoid(se_h @ params["se_w2"].T + params["se_b2"])

    combined = da_scale * se_s[:, None, :]                        # (N, D, C)
    scale_wc = jnp.broadcast_to(combined[:, :, None, :],
                                (N, D, W, C)).reshape(N, D, W * C)

    # out = relu(bn2_out * da * se + residual), lane-dense (W*C) last dim.
    v = h2.reshape(N, D, H, W * C)            # free: identical row-major layout
    res = x.reshape(N, D, H, W * C)
    y = apply_scale_residual_relu(v, res, scale_wc)
    return y.reshape(N, D, H, W, C)


def init_params(key, C, D, reduction=16):
    ks = jax.random.split(key, 16)

    def nrm(k, shape, scale):
        return (scale * jax.random.normal(k, shape)).astype(jnp.float32)

    hid = max(C // reduction, 1)
    return {
        # conv weights in PyTorch layout (Cout, Cin, kD, kH, kW)
        "w1": nrm(ks[0], (C, C, 3, 3, 3), 0.1),
        "w2": nrm(ks[1], (C, C, 3, 3, 3), 0.1),
        # BatchNorm3d: (gamma, beta, running_mean, running_var)
        "bn1": (1.0 + nrm(ks[2], (C,), 0.1), nrm(ks[3], (C,), 0.1),
                nrm(ks[4], (C,), 0.1), 1.0 + jnp.abs(nrm(ks[5], (C,), 0.1))),
        "bn2": (1.0 + nrm(ks[6], (C,), 0.1), nrm(ks[7], (C,), 0.1),
                nrm(ks[8], (C,), 0.1), 1.0 + jnp.abs(nrm(ks[9], (C,), 0.1))),
        # DepthAttention fc: Linear(C*D, D) -> ReLU -> Linear(D, C*D) -> Sigmoid
        "da_w1": nrm(ks[10], (D, C * D), 0.1),
        "da_b1": nrm(ks[11], (D,), 0.1),
        "da_w2": nrm(ks[12], (C * D, D), 0.1),
        "da_b2": nrm(ks[13], (C * D,), 0.1),
        # SELayer fc: Linear(C, C//reduction) -> ReLU -> Linear(C//reduction, C) -> Sigmoid
        "se_w1": nrm(ks[14], (hid, C), 0.1),
        "se_b1": jnp.zeros((hid,), jnp.float32),
        "se_w2": nrm(ks[15], (C, hid), 0.1),
        "se_b2": jnp.zeros((C,), jnp.float32),
    }


if __name__ == "__main__":
    # planes = inplanes = 16, depth = 8, H = W = 8, batch = 2
    # (corresponds to a PyTorch NCDHW input of shape [2, 16, 8, 8, 8]); W*C = 128.
    N, C, D, H, W = 2, 16, 8, 8, 8
    key = jax.random.PRNGKey(0)
    kx, kp = jax.random.split(key)
    x = jax.random.normal(kx, (N, D, H, W, C), dtype=jnp.float32)   # NDHWC
    params = init_params(kp, C, D, reduction=16)

    y = jax.jit(dase_basic_block)(x, params)
    jax.block_until_ready(y)
    assert y.shape == (N, D, H, W, C)
    assert bool(jnp.all(y >= 0.0))   # final ReLU
    print("KERNEL_OK")
</pallas_src>

<mosaic_0001>
module attributes {stable_mosaic.version = 11 : i64} {
  func.func @_conv3d_bn_kernel(%arg0: i32, %arg1: i32, %arg2: i32, %arg3: memref<1x1x10x10x16xbf16, #tpu.memory_space<vmem>>, %arg4: memref<1x9x16x16xbf16, #tpu.memory_space<vmem>>, %arg5: memref<1x16xf32, #tpu.memory_space<vmem>>, %arg6: memref<1x1x64x16xbf16, #tpu.memory_space<vmem>>, %arg7: memref<64x16xf32, #tpu.memory_space<vmem>>) attributes {dimension_semantics = [#tpu.dimension_semantics<parallel>, #tpu.dimension_semantics<parallel>, #tpu.dimension_semantics<arbitrary>], iteration_bounds = array<i64: 2, 8, 3>, scalar_prefetch = 0 : i64, scratch_operands = 1 : i64, tpu.core_type = #tpu.core_type<tc>, window_params = [{transform_indices = @transform_0, window_bounds = array<i64: 1, 1, 10, 10, 16>}, {transform_indices = @transform_1, window_bounds = array<i64: 1, 9, 16, 16>}, {pipeline_mode = #tpu.pipeline_mode<synchronous>, transform_indices = @transform_2, window_bounds = array<i64: 1, 16>}, {transform_indices = @transform_3, window_bounds = array<i64: 1, 1, 64, 16>}]} {
    %c0_i32 = arith.constant 0 : i32
    %0 = arith.cmpi eq, %arg2, %c0_i32 : i32
    %1 = arith.extui %0 : i1 to i32
    %c0_i32_0 = arith.constant 0 : i32
    %2 = arith.cmpi ne, %1, %c0_i32_0 : i32
    scf.if %2 {
      %cst_86 = arith.constant 0.000000e+00 : f32
      %71 = vector.broadcast %cst_86 : f32 to vector<64x16xf32>
      %c0_87 = arith.constant 0 : index
      %c0_88 = arith.constant 0 : index
      %72 = vector.load %arg7[%c0_87, %c0_88] : memref<64x16xf32, #tpu.memory_space<vmem>>, vector<64x16xf32>
      tpu.vector_store %arg7[%c0_87, %c0_88], %71 {strides = array<i32>} : memref<64x16xf32, #tpu.memory_space<vmem>>, vector<64x16xf32>,
    } else {
    }
    %c0 = arith.constant 0 : index
    %c0_1 = arith.constant 0 : index
    %c0_2 = arith.constant 0 : index
    %c0_3 = arith.constant 0 : index
    %c0_4 = arith.constant 0 : index
    %3 = vector.load %arg3[%c0, %c0_1, %c0_2, %c0_3, %c0_4] : memref<1x1x10x10x16xbf16, #tpu.memory_space<vmem>>, vector<1x1x8x8x16xbf16>
    %4 = vector.shape_cast %3 : vector<1x1x8x8x16xbf16> to vector<8x8x16xbf16>
    %5 = vector.shape_cast %4 : vector<8x8x16xbf16> to vector<64x16xbf16>
    %c0_5 = arith.constant 0 : index
    %c0_6 = arith.constant 0 : index
    %c0_7 = arith.constant 0 : index
    %c0_8 = arith.constant 0 : index
    %6 = vector.load %arg4[%c0_5, %c0_6, %c0_7, %c0_8] : memref<1x9x16x16xbf16, #tpu.memory_space<vmem>>, vector<1x1x16x16xbf16>
    %7 = vector.shape_cast %6 : vector<1x1x16x16xbf16> to vector<16x16xbf16>
    %cst = arith.constant dense<0.000000e+00> : vector<64x16xf32>
    %8 = tpu.matmul %5, %7, %cst {dimension_numbers = #tpu.dot_dimension_numbers<[1], [0], [0], [1], [0, 0, 1, 1], [], []>} : vector<64x16xbf16>, vector<16x16xbf16>, vector<64x16xf32> -> vector<64x16xf32>
    %c0_9 = arith.constant 0 : index
    %c0_10 = arith.constant 0 : index
    %c0_11 = arith.constant 0 : index
    %c1 = arith.constant 1 : index
    %c0_12 = arith.constant 0 : index
    %9 = vector.load %arg3[%c0_9, %c0_10, %c0_11, %c1, %c0_12] : memref<1x1x10x10x16xbf16, #tpu.memory_space<vmem>>, vector<1x1x8x8x16xbf16>
    %10 = vector.shape_cast %9 : vector<1x1x8x8x16xbf16> to vector<8x8x16xbf16>
    %11 = vector.shape_cast %10 : vector<8x8x16xbf16> to vector<64x16xbf16>
    %c0_13 = arith.constant 0 : index
    %c1_14 = arith.constant 1 : index
    %c0_15 = arith.constant 0 : index
    %c0_16 = arith.constant 0 : index
    %12 = vector.load %arg4[%c0_13, %c1_14, %c0_15, %c0_16] : memref<1x9x16x16xbf16, #tpu.memory_space<vmem>>, vector<1x1x16x16xbf16>
    %13 = vector.shape_cast %12 : vector<1x1x16x16xbf16> to vector<16x16xbf16>
    %cst_17 = arith.constant dense<0.000000e+00> : vector<64x16xf32>
    %14 = tpu.matmul %11, %13, %cst_17 {dimension_numbers = #tpu.dot_dimension_numbers<[1], [0], [0], [1], [0, 0, 1, 1], [], []>} : vector<64x16xbf16>, vector<16x16xbf16>, vector<64x16xf32> -> vector<64x16xf32>
    %15 = arith.addf %8, %14 : vector<64x16xf32>
    %c0_18 = arith.constant 0 : index
    %c0_19 = arith.constant 0 : index
    %c0_20 = arith.constant 0 : index
    %c2 = arith.constant 2 : index
    %c0_21 = arith.constant 0 : index
    %16 = vector.load %arg3[%c0_18, %c0_19, %c0_20, %c2, %c0_21] : memref<1x1x10x10x16xbf16, #tpu.memory_space<vmem>>, vector<1x1x8x8x16xbf16>
    %17 = vector.shape_cast %16 : vector<1x1x8x8x16xbf16> to vector<8x8x16xbf16>
    %18 = vector.shape_cast %17 : vector<8x8x16xbf16> to vector<64x16xbf16>
    %c0_22 = arith.constant 0 : index
    %c2_23 = arith.constant 2 : index
    %c0_24 = arith.constant 0 : index
    %c0_25 = arith.constant 0 : index
    %19 = vector.load %arg4[%c0_22, %c2_23, %c0_24, %c0_25] : memref<1x9x16x16xbf16, #tpu.memory_space<vmem>>, vector<1x1x16x16xbf16>
    %20 = vector.shape_cast %19 : vector<1x1x16x16xbf16> to vector<16x16xbf16>
    %cst_26 = arith.constant dense<0.000000e+00> : vector<64x16xf32>
    %21 = tpu.matmul %18, %20, %cst_26 {dimension_numbers = #tpu.dot_dimension_numbers<[1], [0], [0], [1], [0, 0, 1, 1], [], []>} : vector<64x16xbf16>, vector<16x16xbf16>, vector<64x16xf32> -> vector<64x16xf32>
    %22 = arith.addf %15, %21 : vector<64x16xf32>
    %c0_27 = arith.constant 0 : index
    %c0_28 = arith.constant 0 : index
    %c1_29 = arith.constant 1 : index
    %c0_30 = arith.constant 0 : index
    %c0_31 = arith.constant 0 : index
    %23 = vector.load %arg3[%c0_27, %c0_28, %c1_29, %c0_30, %c0_31] : memref<1x1x10x10x16xbf16, #tpu.memory_space<vmem>>, vector<1x1x8x8x16xbf16>
    %24 = vector.shape_cast %23 : vector<1x1x8x8x16xbf16> to vector<8x8x16xbf16>
    %25 = vector.shape_cast %24 : vector<8x8x16xbf16> to vector<64x16xbf16>
    %c0_32 = arith.constant 0 : index
    %c3 = arith.constant 3 : index
    %c0_33 = arith.constant 0 : index
    %c0_34 = arith.constant 0 : index
    %26 = vector.load %arg4[%c0_32, %c3, %c0_33, %c0_34] : memref<1x9x16x16xbf16, #tpu.memory_space<vmem>>, vector<1x1x16x16xbf16>
    %27 = vector.shape_cast %26 : vector<1x1x16x16xbf16> to vector<16x16xbf16>
    %cst_35 = arith.constant dense<0.000000e+00> : vector<64x16xf32>
    %28 = tpu.matmul %25, %27, %cst_35 {dimension_numbers = #tpu.dot_dimension_numbers<[1], [0], [0], [1], [0, 0, 1, 1], [], []>} : vector<64x16xbf16>, vector<16x16xbf16>, vector<64x16xf32> -> vector<64x16xf32>
    %29 = arith.addf %22, %28 : vector<64x16xf32>
    %c0_36 = arith.constant 0 : index
    %c0_37 = arith.constant 0 : index
    %c1_38 = arith.constant 1 : index
    %c1_39 = arith.constant 1 : index
    %c0_40 = arith.constant 0 : index
    %30 = vector.load %arg3[%c0_36, %c0_37, %c1_38, %c1_39, %c0_40] : memref<1x1x10x10x16xbf16, #tpu.memory_space<vmem>>, vector<1x1x8x8x16xbf16>
    %31 = vector.shape_cast %30 : vector<1x1x8x8x16xbf16> to vector<8x8x16xbf16>
    %32 = vector.shape_cast %31 : vector<8x8x16xbf16> to vector<64x16xbf16>
    %c0_41 = arith.constant 0 : index
    %c4 = arith.constant 4 : index
    %c0_42 = arith.constant 0 : index
    %c0_43 = arith.constant 0 : index
    %33 = vector.load %arg4[%c0_41, %c4, %c0_42, %c0_43] : memref<1x9x16x16xbf16, #tpu.memory_space<vmem>>, vector<1x1x16x16xbf16>
    %34 = vector.shape_cast %33 : vector<1x1x16x16xbf16> to vector<16x16xbf16>
    %cst_44 = arith.constant dense<0.000000e+00> : vector<64x16xf32>
    %35 = tpu.matmul %32, %34, %cst_44 {dimension_numbers = #tpu.dot_dimension_numbers<[1], [0], [0], [1], [0, 0, 1, 1], [], []>} : vector<64x16xbf16>, vector<16x16xbf16>, vector<64x16xf32> -> vector<64x16xf32>
    %36 = arith.addf %29, %35 : vector<64x16xf32>
    %c0_45 = arith.constant 0 : index
    %c0_46 = arith.constant 0 : index
    %c1_47 = arith.constant 1 : index
    %c2_48 = arith.constant 2 : index
    %c0_49 = arith.constant 0 : index
    %37 = vector.load %arg3[%c0_45, %c0_46, %c1_47, %c2_48, %c0_49] : memref<1x1x10x10x16xbf16, #tpu.memory_space<vmem>>, vector<1x1x8x8x16xbf16>
    %38 = vector.shape_cast %37 : vector<1x1x8x8x16xbf16> to vector<8x8x16xbf16>
    %39 = vector.shape_cast %38 : vector<8x8x16xbf16> to vector<64x16xbf16>
    %c0_50 = arith.constant 0 : index
    %c5 = arith.constant 5 : index
    %c0_51 = arith.constant 0 : index
    %c0_52 = arith.constant 0 : index
    %40 = vector.load %arg4[%c0_50, %c5, %c0_51, %c0_52] : memref<1x9x16x16xbf16, #tpu.memory_space<vmem>>, vector<1x1x16x16xbf16>
    %41 = vector.shape_cast %40 : vector<1x1x16x16xbf16> to vector<16x16xbf16>
    %cst_53 = arith.constant dense<0.000000e+00> : vector<64x16xf32>
    %42 = tpu.matmul %39, %41, %cst_53 {dimension_numbers = #tpu.dot_dimension_numbers<[1], [0], [0], [1], [0, 0, 1, 1], [], []>} : vector<64x16xbf16>, vector<16x16xbf16>, vector<64x16xf32> -> vector<64x16xf32>
    %43 = arith.addf %36, %42 : vector<64x16xf32>
    %c0_54 = arith.constant 0 : index
    %c0_55 = arith.constant 0 : index
    %c2_56 = arith.constant 2 : index
    %c0_57 = arith.constant 0 : index
    %c0_58 = arith.constant 0 : index
    %44 = vector.load %arg3[%c0_54, %c0_55, %c2_56, %c0_57, %c0_58] : memref<1x1x10x10x16xbf16, #tpu.memory_space<vmem>>, vector<1x1x8x8x16xbf16>
    %45 = vector.shape_cast %44 : vector<1x1x8x8x16xbf16> to vector<8x8x16xbf16>
    %46 = vector.shape_cast %45 : vector<8x8x16xbf16> to vector<64x16xbf16>
    %c0_59 = arith.constant 0 : index
    %c6 = arith.constant 6 : index
    %c0_60 = arith.constant 0 : index
    %c0_61 = arith.constant 0 : index
    %47 = vector.load %arg4[%c0_59, %c6, %c0_60, %c0_61] : memref<1x9x16x16xbf16, #tpu.memory_space<vmem>>, vector<1x1x16x16xbf16>
    %48 = vector.shape_cast %47 : vector<1x1x16x16xbf16> to vector<16x16xbf16>
    %cst_62 = arith.constant dense<0.000000e+00> : vector<64x16xf32>
    %49 = tpu.matmul %46, %48, %cst_62 {dimension_numbers = #tpu.dot_dimension_numbers<[1], [0], [0], [1], [0, 0, 1, 1], [], []>} : vector<64x16xbf16>, vector<16x16xbf16>, vector<64x16xf32> -> vector<64x16xf32>
    %50 = arith.addf %43, %49 : vector<64x16xf32>
    %c0_63 = arith.constant 0 : index
    %c0_64 = arith.constant 0 : index
    %c2_65 = arith.constant 2 : index
    %c1_66 = arith.constant 1 : index
    %c0_67 = arith.constant 0 : index
    %51 = vector.load %arg3[%c0_63, %c0_64, %c2_65, %c1_66, %c0_67] : memref<1x1x10x10x16xbf16, #tpu.memory_space<vmem>>, vector<1x1x8x8x16xbf16>
    %52 = vector.shape_cast %51 : vector<1x1x8x8x16xbf16> to vector<8x8x16xbf16>
    %53 = vector.shape_cast %52 : vector<8x8x16xbf16> to vector<64x16xbf16>
    %c0_68 = arith.constant 0 : index
    %c7 = arith.constant 7 : index
    %c0_69 = arith.constant 0 : index
    %c0_70 = arith.constant 0 : index
    %54 = vector.load %arg4[%c0_68, %c7, %c0_69, %c0_70] : memref<1x9x16x16xbf16, #tpu.memory_space<vmem>>, vector<1x1x16x16xbf16>
    %55 = vector.shape_cast %54 : vector<1x1x16x16xbf16> to vector<16x16xbf16>
    %cst_71 = arith.constant dense<0.000000e+00> : vector<64x16xf32>
    %56 = tpu.matmul %53, %55, %cst_71 {dimension_numbers = #tpu.dot_dimension_numbers<[1], [0], [0], [1], [0, 0, 1, 1], [], []>} : vector<64x16xbf16>, vector<16x16xbf16>, vector<64x16xf32> -> vector<64x16xf32>
    %57 = arith.addf %50, %56 : vector<64x16xf32>
    %c0_72 = arith.constant 0 : index
    %c0_73 = arith.constant 0 : index
    %c2_74 = arith.constant 2 : index
    %c2_75 = arith.constant 2 : index
    %c0_76 = arith.constant 0 : index
    %58 = vector.load %arg3[%c0_72, %c0_73, %c2_74, %c2_75, %c0_76] : memref<1x1x10x10x16xbf16, #tpu.memory_space<vmem>>, vector<1x1x8x8x16xbf16>
    %59 = vector.shape_cast %58 : vector<1x1x8x8x16xbf16> to vector<8x8x16xbf16>
    %60 = vector.shape_cast %59 : vector<8x8x16xbf16> to vector<64x16xbf16>
    %c0_77 = arith.constant 0 : index
    %c8 = arith.constant 8 : index
    %c0_78 = arith.constant 0 : index
    %c0_79 = arith.constant 0 : index
    %61 = vector.load %arg4[%c0_77, %c8, %c0_78, %c0_79] : memref<1x9x16x16xbf16, #tpu.memory_space<vmem>>, vector<1x1x16x16xbf16>
    %62 = vector.shape_cast %61 : vector<1x1x16x16xbf16> to vector<16x16xbf16>
    %cst_80 = arith.constant dense<0.000000e+00> : vector<64x16xf32>
    %63 = tpu.matmul %60, %62, %cst_80 {dimension_numbers = #tpu.dot_dimension_numbers<[1], [0], [0], [1], [0, 0, 1, 1], [], []>} : vector<64x16xbf16>, vector<16x16xbf16>, vector<64x16xf32> -> vector<64x16xf32>
    %64 = arith.addf %57, %63 : vector<64x16xf32>
    %c0_81 = arith.constant 0 : index
    %c0_82 = arith.constant 0 : index
    %65 = vector.load %arg7[%c0_81, %c0_82] : memref<64x16xf32, #tpu.memory_space<vmem>>, vector<64x16xf32>
    %66 = arith.addf %65, %64 : vector<64x16xf32>
    %c0_83 = arith.constant 0 : index
    %c0_84 = arith.constant 0 : index
    %67 = vector.load %arg7[%c0_83, %c0_84] : memref<64x16xf32, #tpu.memory_space<vmem>>, vector<64x16xf32>
    tpu.vector_store %arg7[%c0_83, %c0_84], %66 {strides = array<i32>} : memref<64x16xf32, #tpu.memory_space<vmem>>, vector<64x16xf32>,
    %c2_i32 = arith.constant 2 : i32
    %68 = arith.cmpi eq, %arg2, %c2_i32 : i32
    %69 = arith.extui %68 : i1 to i32
    %c0_i32_85 = arith.constant 0 : i32
    %70 = arith.cmpi ne, %69, %c0_i32_85 : i32
    scf.if %70 {
      %c0_86 = arith.constant 0 : index
      %c0_87 = arith.constant 0 : index
      %71 = vector.load %arg7[%c0_86, %c0_87] : memref<64x16xf32, #tpu.memory_space<vmem>>, vector<64x16xf32>
      %c0_88 = arith.constant 0 : index
      %c0_89 = arith.constant 0 : index
      %72 = vector.load %arg5[%c0_88, %c0_89] : memref<1x16xf32, #tpu.memory_space<vmem>>, vector<1x16xf32>
      %73 = vector.broadcast %72 : vector<1x16xf32> to vector<64x16xf32>
      %74 = arith.addf %71, %73 : vector<64x16xf32>
      %cst_90 = arith.constant 0.000000e+00 : f32
      %75 = vector.broadcast %cst_90 : f32 to vector<64x16xf32>
      %76 = arith.maximumf %74, %75 : vector<64x16xf32>
      %77 = arith.truncf %76 : vector<64x16xf32> to vector<64x16xbf16>
      %c0_91 = arith.constant 0 : index
      %c0_92 = arith.constant 0 : index
      %c0_93 = arith.constant 0 : index
      %c0_94 = arith.constant 0 : index
      %78 = vector.load %arg6[%c0_91, %c0_92, %c0_93, %c0_94] : memref<1x1x64x16xbf16, #tpu.memory_space<vmem>>, vector<1x1x64x16xbf16>
      %79 = vector.shape_cast %78 : vector<1x1x64x16xbf16> to vector<64x16xbf16>
      %80 = vector.shape_cast %77 : vector<64x16xbf16> to vector<1x1x64x16xbf16>
      tpu.vector_store %arg6[%c0_91, %c0_92, %c0_93, %c0_94], %80 {strides = array<i32>} : memref<1x1x64x16xbf16, #tpu.memory_space<vmem>>, vector<1x1x64x16xbf16>,
    } else {
    }
    return
  }
  func.func @transform_0(%arg0: i32, %arg1: i32, %arg2: i32) -> (i32, i32, i32, i32, i32) {
    %0 = arith.addi %arg1, %arg2 : i32
    %c0_i32 = arith.constant 0 : i32
    %c0_i32_0 = arith.constant 0 : i32
    %c0_i32_1 = arith.constant 0 : i32
    %c0_i32_2 = arith.constant 0 : i32
    return %arg0, %0, %c0_i32, %c0_i32_0, %c0_i32_1 : i32, i32, i32, i32, i32
  }
  func.func @transform_1(%arg0: i32, %arg1: i32, %arg2: i32) -> (i32, i32, i32, i32) {
    %c0_i32 = arith.constant 0 : i32
    %c0_i32_0 = arith.constant 0 : i32
    %c0_i32_1 = arith.constant 0 : i32
    %c0_i32_2 = arith.constant 0 : i32
    return %arg2, %c0_i32, %c0_i32_0, %c0_i32_1 : i32, i32, i32, i32
  }
  func.func @transform_2(%arg0: i32, %arg1: i32, %arg2: i32) -> (i32, i32) {
    %c0_i32 = arith.constant 0 : i32
    %c0_i32_0 = arith.constant 0 : i32
    %c0_i32_1 = arith.constant 0 : i32
    return %c0_i32, %c0_i32_0 : i32, i32
  }
  func.func @transform_3(%arg0: i32, %arg1: i32, %arg2: i32) -> (i32, i32, i32, i32) {
    %c0_i32 = arith.constant 0 : i32
    %c0_i32_0 = arith.constant 0 : i32
    %c0_i32_1 = arith.constant 0 : i32
    return %arg0, %arg1, %c0_i32, %c0_i32_0 : i32, i32, i32, i32
  }
}

module attributes {stable_mosaic.version = 11 : i64} {
  func.func @_conv3d_bn_kernel(%arg0: i32, %arg1: i32, %arg2: i32, %arg3: memref<1x1x10x10x16xbf16, #tpu.memory_space<vmem>>, %arg4: memref<1x9x16x16xbf16, #tpu.memory_space<vmem>>, %arg5: memref<1x16xf32, #tpu.memory_space<vmem>>, %arg6: memref<1x1x64x16xf32, #tpu.memory_space<vmem>>, %arg7: memref<1x1x1x16xf32, #tpu.memory_space<vmem>>, %arg8: memref<64x16xf32, #tpu.memory_space<vmem>>) attributes {dimension_semantics = [#tpu.dimension_semantics<parallel>, #tpu.dimension_semantics<parallel>, #tpu.dimension_semantics<arbitrary>], iteration_bounds = array<i64: 2, 8, 3>, scalar_prefetch = 0 : i64, scratch_operands = 1 : i64, tpu.core_type = #tpu.core_type<tc>, window_params = [{transform_indices = @transform_0, window_bounds = array<i64: 1, 1, 10, 10, 16>}, {transform_indices = @transform_1, window_bounds = array<i64: 1, 9, 16, 16>}, {pipeline_mode = #tpu.pipeline_mode<synchronous>, transform_indices = @transform_2, window_bounds = array<i64: 1, 16>}, {transform_indices = @transform_3, window_bounds = array<i64: 1, 1, 64, 16>}, {transform_indices = @transform_4, window_bounds = array<i64: 1, 1, 1, 16>}]} {
    %c0_i32 = arith.constant 0 : i32
    %0 = arith.cmpi eq, %arg2, %c0_i32 : i32
    %1 = arith.extui %0 : i1 to i32
    %c0_i32_0 = arith.constant 0 : i32
    %2 = arith.cmpi ne, %1, %c0_i32_0 : i32
    scf.if %2 {
      %cst_86 = arith.constant 0.000000e+00 : f32
      %71 = vector.broadcast %cst_86 : f32 to vector<64x16xf32>
      %c0_87 = arith.constant 0 : index
      %c0_88 = arith.constant 0 : index
      %72 = vector.load %arg8[%c0_87, %c0_88] : memref<64x16xf32, #tpu.memory_space<vmem>>, vector<64x16xf32>
      tpu.vector_store %arg8[%c0_87, %c0_88], %71 {strides = array<i32>} : memref<64x16xf32, #tpu.memory_space<vmem>>, vector<64x16xf32>,
    } else {
    }
    %c0 = arith.constant 0 : index
    %c0_1 = arith.constant 0 : index
    %c0_2 = arith.constant 0 : index
    %c0_3 = arith.constant 0 : index
    %c0_4 = arith.constant 0 : index
    %3 = vector.load %arg3[%c0, %c0_1, %c0_2, %c0_3, %c0_4] : memref<1x1x10x10x16xbf16, #tpu.memory_space<vmem>>, vector<1x1x8x8x16xbf16>
    %4 = vector.shape_cast %3 : vector<1x1x8x8x16xbf16> to vector<8x8x16xbf16>
    %5 = vector.shape_cast %4 : vector<8x8x16xbf16> to vector<64x16xbf16>
    %c0_5 = arith.constant 0 : index
    %c0_6 = arith.constant 0 : index
    %c0_7 = arith.constant 0 : index
    %c0_8 = arith.constant 0 : index
    %6 = vector.load %arg4[%c0_5, %c0_6, %c0_7, %c0_8] : memref<1x9x16x16xbf16, #tpu.memory_space<vmem>>, vector<1x1x16x16xbf16>
    %7 = vector.shape_cast %6 : vector<1x1x16x16xbf16> to vector<16x16xbf16>
    %cst = arith.constant dense<0.000000e+00> : vector<64x16xf32>
    %8 = tpu.matmul %5, %7, %cst {dimension_numbers = #tpu.dot_dimension_numbers<[1], [0], [0], [1], [0, 0, 1, 1], [], []>} : vector<64x16xbf16>, vector<16x16xbf16>, vector<64x16xf32> -> vector<64x16xf32>
    %c0_9 = arith.constant 0 : index
    %c0_10 = arith.constant 0 : index
    %c0_11 = arith.constant 0 : index
    %c1 = arith.constant 1 : index
    %c0_12 = arith.constant 0 : index
    %9 = vector.load %arg3[%c0_9, %c0_10, %c0_11, %c1, %c0_12] : memref<1x1x10x10x16xbf16, #tpu.memory_space<vmem>>, vector<1x1x8x8x16xbf16>
    %10 = vector.shape_cast %9 : vector<1x1x8x8x16xbf16> to vector<8x8x16xbf16>
    %11 = vector.shape_cast %10 : vector<8x8x16xbf16> to vector<64x16xbf16>
    %c0_13 = arith.constant 0 : index
    %c1_14 = arith.constant 1 : index
    %c0_15 = arith.constant 0 : index
    %c0_16 = arith.constant 0 : index
    %12 = vector.load %arg4[%c0_13, %c1_14, %c0_15, %c0_16] : memref<1x9x16x16xbf16, #tpu.memory_space<vmem>>, vector<1x1x16x16xbf16>
    %13 = vector.shape_cast %12 : vector<1x1x16x16xbf16> to vector<16x16xbf16>
    %cst_17 = arith.constant dense<0.000000e+00> : vector<64x16xf32>
    %14 = tpu.matmul %11, %13, %cst_17 {dimension_numbers = #tpu.dot_dimension_numbers<[1], [0], [0], [1], [0, 0, 1, 1], [], []>} : vector<64x16xbf16>, vector<16x16xbf16>, vector<64x16xf32> -> vector<64x16xf32>
    %15 = arith.addf %8, %14 : vector<64x16xf32>
    %c0_18 = arith.constant 0 : index
    %c0_19 = arith.constant 0 : index
    %c0_20 = arith.constant 0 : index
    %c2 = arith.constant 2 : index
    %c0_21 = arith.constant 0 : index
    %16 = vector.load %arg3[%c0_18, %c0_19, %c0_20, %c2, %c0_21] : memref<1x1x10x10x16xbf16, #tpu.memory_space<vmem>>, vector<1x1x8x8x16xbf16>
    %17 = vector.shape_cast %16 : vector<1x1x8x8x16xbf16> to vector<8x8x16xbf16>
    %18 = vector.shape_cast %17 : vector<8x8x16xbf16> to vector<64x16xbf16>
    %c0_22 = arith.constant 0 : index
    %c2_23 = arith.constant 2 : index
    %c0_24 = arith.constant 0 : index
    %c0_25 = arith.constant 0 : index
    %19 = vector.load %arg4[%c0_22, %c2_23, %c0_24, %c0_25] : memref<1x9x16x16xbf16, #tpu.memory_space<vmem>>, vector<1x1x16x16xbf16>
    %20 = vector.shape_cast %19 : vector<1x1x16x16xbf16> to vector<16x16xbf16>
    %cst_26 = arith.constant dense<0.000000e+00> : vector<64x16xf32>
    %21 = tpu.matmul %18, %20, %cst_26 {dimension_numbers = #tpu.dot_dimension_numbers<[1], [0], [0], [1], [0, 0, 1, 1], [], []>} : vector<64x16xbf16>, vector<16x16xbf16>, vector<64x16xf32> -> vector<64x16xf32>
    %22 = arith.addf %15, %21 : vector<64x16xf32>
    %c0_27 = arith.constant 0 : index
    %c0_28 = arith.constant 0 : index
    %c1_29 = arith.constant 1 : index
    %c0_30 = arith.constant 0 : index
    %c0_31 = arith.constant 0 : index
    %23 = vector.load %arg3[%c0_27, %c0_28, %c1_29, %c0_30, %c0_31] : memref<1x1x10x10x16xbf16, #tpu.memory_space<vmem>>, vector<1x1x8x8x16xbf16>
    %24 = vector.shape_cast %23 : vector<1x1x8x8x16xbf16> to vector<8x8x16xbf16>
    %25 = vector.shape_cast %24 : vector<8x8x16xbf16> to vector<64x16xbf16>
    %c0_32 = arith.constant 0 : index
    %c3 = arith.constant 3 : index
    %c0_33 = arith.constant 0 : index
    %c0_34 = arith.constant 0 : index
    %26 = vector.load %arg4[%c0_32, %c3, %c0_33, %c0_34] : memref<1x9x16x16xbf16, #tpu.memory_space<vmem>>, vector<1x1x16x16xbf16>
    %27 = vector.shape_cast %26 : vector<1x1x16x16xbf16> to vector<16x16xbf16>
    %cst_35 = arith.constant dense<0.000000e+00> : vector<64x16xf32>
    %28 = tpu.matmul %25, %27, %cst_35 {dimension_numbers = #tpu.dot_dimension_numbers<[1], [0], [0], [1], [0, 0, 1, 1], [], []>} : vector<64x16xbf16>, vector<16x16xbf16>, vector<64x16xf32> -> vector<64x16xf32>
    %29 = arith.addf %22, %28 : vector<64x16xf32>
    %c0_36 = arith.constant 0 : index
    %c0_37 = arith.constant 0 : index
    %c1_38 = arith.constant 1 : index
    %c1_39 = arith.constant 1 : index
    %c0_40 = arith.constant 0 : index
    %30 = vector.load %arg3[%c0_36, %c0_37, %c1_38, %c1_39, %c0_40] : memref<1x1x10x10x16xbf16, #tpu.memory_space<vmem>>, vector<1x1x8x8x16xbf16>
    %31 = vector.shape_cast %30 : vector<1x1x8x8x16xbf16> to vector<8x8x16xbf16>
    %32 = vector.shape_cast %31 : vector<8x8x16xbf16> to vector<64x16xbf16>
    %c0_41 = arith.constant 0 : index
    %c4 = arith.constant 4 : index
    %c0_42 = arith.constant 0 : index
    %c0_43 = arith.constant 0 : index
    %33 = vector.load %arg4[%c0_41, %c4, %c0_42, %c0_43] : memref<1x9x16x16xbf16, #tpu.memory_space<vmem>>, vector<1x1x16x16xbf16>
    %34 = vector.shape_cast %33 : vector<1x1x16x16xbf16> to vector<16x16xbf16>
    %cst_44 = arith.constant dense<0.000000e+00> : vector<64x16xf32>
    %35 = tpu.matmul %32, %34, %cst_44 {dimension_numbers = #tpu.dot_dimension_numbers<[1], [0], [0], [1], [0, 0, 1, 1], [], []>} : vector<64x16xbf16>, vector<16x16xbf16>, vector<64x16xf32> -> vector<64x16xf32>
    %36 = arith.addf %29, %35 : vector<64x16xf32>
    %c0_45 = arith.constant 0 : index
    %c0_46 = arith.constant 0 : index
    %c1_47 = arith.constant 1 : index
    %c2_48 = arith.constant 2 : index
    %c0_49 = arith.constant 0 : index
    %37 = vector.load %arg3[%c0_45, %c0_46, %c1_47, %c2_48, %c0_49] : memref<1x1x10x10x16xbf16, #tpu.memory_space<vmem>>, vector<1x1x8x8x16xbf16>
    %38 = vector.shape_cast %37 : vector<1x1x8x8x16xbf16> to vector<8x8x16xbf16>
    %39 = vector.shape_cast %38 : vector<8x8x16xbf16> to vector<64x16xbf16>
    %c0_50 = arith.constant 0 : index
    %c5 = arith.constant 5 : index
    %c0_51 = arith.constant 0 : index
    %c0_52 = arith.constant 0 : index
    %40 = vector.load %arg4[%c0_50, %c5, %c0_51, %c0_52] : memref<1x9x16x16xbf16, #tpu.memory_space<vmem>>, vector<1x1x16x16xbf16>
    %41 = vector.shape_cast %40 : vector<1x1x16x16xbf16> to vector<16x16xbf16>
    %cst_53 = arith.constant dense<0.000000e+00> : vector<64x16xf32>
    %42 = tpu.matmul %39, %41, %cst_53 {dimension_numbers = #tpu.dot_dimension_numbers<[1], [0], [0], [1], [0, 0, 1, 1], [], []>} : vector<64x16xbf16>, vector<16x16xbf16>, vector<64x16xf32> -> vector<64x16xf32>
    %43 = arith.addf %36, %42 : vector<64x16xf32>
    %c0_54 = arith.constant 0 : index
    %c0_55 = arith.constant 0 : index
    %c2_56 = arith.constant 2 : index
    %c0_57 = arith.constant 0 : index
    %c0_58 = arith.constant 0 : index
    %44 = vector.load %arg3[%c0_54, %c0_55, %c2_56, %c0_57, %c0_58] : memref<1x1x10x10x16xbf16, #tpu.memory_space<vmem>>, vector<1x1x8x8x16xbf16>
    %45 = vector.shape_cast %44 : vector<1x1x8x8x16xbf16> to vector<8x8x16xbf16>
    %46 = vector.shape_cast %45 : vector<8x8x16xbf16> to vector<64x16xbf16>
    %c0_59 = arith.constant 0 : index
    %c6 = arith.constant 6 : index
    %c0_60 = arith.constant 0 : index
    %c0_61 = arith.constant 0 : index
    %47 = vector.load %arg4[%c0_59, %c6, %c0_60, %c0_61] : memref<1x9x16x16xbf16, #tpu.memory_space<vmem>>, vector<1x1x16x16xbf16>
    %48 = vector.shape_cast %47 : vector<1x1x16x16xbf16> to vector<16x16xbf16>
    %cst_62 = arith.constant dense<0.000000e+00> : vector<64x16xf32>
    %49 = tpu.matmul %46, %48, %cst_62 {dimension_numbers = #tpu.dot_dimension_numbers<[1], [0], [0], [1], [0, 0, 1, 1], [], []>} : vector<64x16xbf16>, vector<16x16xbf16>, vector<64x16xf32> -> vector<64x16xf32>
    %50 = arith.addf %43, %49 : vector<64x16xf32>
    %c0_63 = arith.constant 0 : index
    %c0_64 = arith.constant 0 : index
    %c2_65 = arith.constant 2 : index
    %c1_66 = arith.constant 1 : index
    %c0_67 = arith.constant 0 : index
    %51 = vector.load %arg3[%c0_63, %c0_64, %c2_65, %c1_66, %c0_67] : memref<1x1x10x10x16xbf16, #tpu.memory_space<vmem>>, vector<1x1x8x8x16xbf16>
    %52 = vector.shape_cast %51 : vector<1x1x8x8x16xbf16> to vector<8x8x16xbf16>
    %53 = vector.shape_cast %52 : vector<8x8x16xbf16> to vector<64x16xbf16>
    %c0_68 = arith.constant 0 : index
    %c7 = arith.constant 7 : index
    %c0_69 = arith.constant 0 : index
    %c0_70 = arith.constant 0 : index
    %54 = vector.load %arg4[%c0_68, %c7, %c0_69, %c0_70] : memref<1x9x16x16xbf16, #tpu.memory_space<vmem>>, vector<1x1x16x16xbf16>
    %55 = vector.shape_cast %54 : vector<1x1x16x16xbf16> to vector<16x16xbf16>
    %cst_71 = arith.constant dense<0.000000e+00> : vector<64x16xf32>
    %56 = tpu.matmul %53, %55, %cst_71 {dimension_numbers = #tpu.dot_dimension_numbers<[1], [0], [0], [1], [0, 0, 1, 1], [], []>} : vector<64x16xbf16>, vector<16x16xbf16>, vector<64x16xf32> -> vector<64x16xf32>
    %57 = arith.addf %50, %56 : vector<64x16xf32>
    %c0_72 = arith.constant 0 : index
    %c0_73 = arith.constant 0 : index
    %c2_74 = arith.constant 2 : index
    %c2_75 = arith.constant 2 : index
    %c0_76 = arith.constant 0 : index
    %58 = vector.load %arg3[%c0_72, %c0_73, %c2_74, %c2_75, %c0_76] : memref<1x1x10x10x16xbf16, #tpu.memory_space<vmem>>, vector<1x1x8x8x16xbf16>
    %59 = vector.shape_cast %58 : vector<1x1x8x8x16xbf16> to vector<8x8x16xbf16>
    %60 = vector.shape_cast %59 : vector<8x8x16xbf16> to vector<64x16xbf16>
    %c0_77 = arith.constant 0 : index
    %c8 = arith.constant 8 : index
    %c0_78 = arith.constant 0 : index
    %c0_79 = arith.constant 0 : index
    %61 = vector.load %arg4[%c0_77, %c8, %c0_78, %c0_79] : memref<1x9x16x16xbf16, #tpu.memory_space<vmem>>, vector<1x1x16x16xbf16>
    %62 = vector.shape_cast %61 : vector<1x1x16x16xbf16> to vector<16x16xbf16>
    %cst_80 = arith.constant dense<0.000000e+00> : vector<64x16xf32>
    %63 = tpu.matmul %60, %62, %cst_80 {dimension_numbers = #tpu.dot_dimension_numbers<[1], [0], [0], [1], [0, 0, 1, 1], [], []>} : vector<64x16xbf16>, vector<16x16xbf16>, vector<64x16xf32> -> vector<64x16xf32>
    %64 = arith.addf %57, %63 : vector<64x16xf32>
    %c0_81 = arith.constant 0 : index
    %c0_82 = arith.constant 0 : index
    %65 = vector.load %arg8[%c0_81, %c0_82] : memref<64x16xf32, #tpu.memory_space<vmem>>, vector<64x16xf32>
    %66 = arith.addf %65, %64 : vector<64x16xf32>
    %c0_83 = arith.constant 0 : index
    %c0_84 = arith.constant 0 : index
    %67 = vector.load %arg8[%c0_83, %c0_84] : memref<64x16xf32, #tpu.memory_space<vmem>>, vector<64x16xf32>
    tpu.vector_store %arg8[%c0_83, %c0_84], %66 {strides = array<i32>} : memref<64x16xf32, #tpu.memory_space<vmem>>, vector<64x16xf32>,
    %c2_i32 = arith.constant 2 : i32
    %68 = arith.cmpi eq, %arg2, %c2_i32 : i32
    %69 = arith.extui %68 : i1 to i32
    %c0_i32_85 = arith.constant 0 : i32
    %70 = arith.cmpi ne, %69, %c0_i32_85 : i32
    scf.if %70 {
      %c0_86 = arith.constant 0 : index
      %c0_87 = arith.constant 0 : index
      %71 = vector.load %arg8[%c0_86, %c0_87] : memref<64x16xf32, #tpu.memory_space<vmem>>, vector<64x16xf32>
      %c0_88 = arith.constant 0 : index
      %c0_89 = arith.constant 0 : index
      %72 = vector.load %arg5[%c0_88, %c0_89] : memref<1x16xf32, #tpu.memory_space<vmem>>, vector<1x16xf32>
      %73 = vector.broadcast %72 : vector<1x16xf32> to vector<64x16xf32>
      %74 = arith.addf %71, %73 : vector<64x16xf32>
      %c0_90 = arith.constant 0 : index
      %c0_91 = arith.constant 0 : index
      %c0_92 = arith.constant 0 : index
      %c0_93 = arith.constant 0 : index
      %75 = vector.load %arg6[%c0_90, %c0_91, %c0_92, %c0_93] : memref<1x1x64x16xf32, #tpu.memory_space<vmem>>, vector<1x1x64x16xf32>
      %76 = vector.shape_cast %75 : vector<1x1x64x16xf32> to vector<64x16xf32>
      %77 = vector.shape_cast %74 : vector<64x16xf32> to vector<1x1x64x16xf32>
      tpu.vector_store %arg6[%c0_90, %c0_91, %c0_92, %c0_93], %77 {strides = array<i32>} : memref<1x1x64x16xf32, #tpu.memory_space<vmem>>, vector<1x1x64x16xf32>,
      %cst_94 = arith.constant dense<0.000000e+00> : vector<16xf32>
      %78 = vector.multi_reduction <add>, %74, %cst_94 [0] : vector<64x16xf32> to vector<16xf32>
      %79 = vector.shape_cast %78 : vector<16xf32> to vector<1x16xf32>
      %cst_95 = arith.constant 6.400000e+01 : f32
      %80 = vector.broadcast %cst_95 : f32 to vector<1x16xf32>
      %81 = arith.divf %79, %80 : vector<1x16xf32>
      %c0_96 = arith.constant 0 : index
      %c0_97 = arith.constant 0 : index
      %c0_98 = arith.constant 0 : index
      %c0_99 = arith.constant 0 : index
      %82 = vector.load %arg7[%c0_96, %c0_97, %c0_98, %c0_99] : memref<1x1x1x16xf32, #tpu.memory_space<vmem>>, vector<1x1x1x16xf32>
      %83 = vector.shape_cast %82 : vector<1x1x1x16xf32> to vector<1x16xf32>
      %84 = vector.shape_cast %81 : vector<1x16xf32> to vector<1x1x1x16xf32>
      tpu.vector_store %arg7[%c0_96, %c0_97, %c0_98, %c0_99], %84 {strides = array<i32>} : memref<1x1x1x16xf32, #tpu.memory_space<vmem>>, vector<1x1x1x16xf32>,
    } else {
    }
    return
  }
  func.func @transform_0(%arg0: i32, %arg1: i32, %arg2: i32) -> (i32, i32, i32, i32, i32) {
    %0 = arith.addi %arg1, %arg2 : i32
    %c0_i32 = arith.constant 0 : i32
    %c0_i32_0 = arith.constant 0 : i32
    %c0_i32_1 = arith.constant 0 : i32
    %c0_i32_2 = arith.constant 0 : i32
    return %arg0, %0, %c0_i32, %c0_i32_0, %c0_i32_1 : i32, i32, i32, i32, i32
  }
  func.func @transform_1(%arg0: i32, %arg1: i32, %arg2: i32) -> (i32, i32, i32, i32) {
    %c0_i32 = arith.constant 0 : i32
    %c0_i32_0 = arith.constant 0 : i32
    %c0_i32_1 = arith.constant 0 : i32
    %c0_i32_2 = arith.constant 0 : i32
    return %arg2, %c0_i32, %c0_i32_0, %c0_i32_1 : i32, i32, i32, i32
  }
  func.func @transform_2(%arg0: i32, %arg1: i32, %arg2: i32) -> (i32, i32) {
    %c0_i32 = arith.constant 0 : i32
    %c0_i32_0 = arith.constant 0 : i32
    %c0_i32_1 = arith.constant 0 : i32
    return %c0_i32, %c0_i32_0 : i32, i32
  }
  func.func @transform_3(%arg0: i32, %arg1: i32, %arg2: i32) -> (i32, i32, i32, i32) {
    %c0_i32 = arith.constant 0 : i32
    %c0_i32_0 = arith.constant 0 : i32
    %c0_i32_1 = arith.constant 0 : i32
    return %arg0, %arg1, %c0_i32, %c0_i32_0 : i32, i32, i32, i32
  }
  func.func @transform_4(%arg0: i32, %arg1: i32, %arg2: i32) -> (i32, i32, i32, i32) {
    %c0_i32 = arith.constant 0 : i32
    %c0_i32_0 = arith.constant 0 : i32
    %c0_i32_1 = arith.constant 0 : i32
    return %arg0, %arg1, %c0_i32, %c0_i32_0 : i32, i32, i32, i32
  }
}

module attributes {stable_mosaic.version = 11 : i64} {
  func.func @_apply_kernel(%arg0: i32, %arg1: i32, %arg2: memref<1x8x8x128xf32, #tpu.memory_space<vmem>>, %arg3: memref<1x8x8x128xf32, #tpu.memory_space<vmem>>, %arg4: memref<1x8x128xf32, #tpu.memory_space<vmem>>, %arg5: memref<1x8x8x128xf32, #tpu.memory_space<vmem>>) attributes {dimension_semantics = [#tpu.dimension_semantics<parallel>, #tpu.dimension_semantics<parallel>], iteration_bounds = array<i64: 2, 1>, scalar_prefetch = 0 : i64, scratch_operands = 0 : i64, tpu.core_type = #tpu.core_type<tc>, window_params = [{transform_indices = @transform_0, window_bounds = array<i64: 1, 8, 8, 128>}, {transform_indices = @transform_1, window_bounds = array<i64: 1, 8, 8, 128>}, {transform_indices = @transform_2, window_bounds = array<i64: 1, 8, 128>}, {transform_indices = @transform_3, window_bounds = array<i64: 1, 8, 8, 128>}]} {
    %c0 = arith.constant 0 : index
    %c0_0 = arith.constant 0 : index
    %c0_1 = arith.constant 0 : index
    %c0_2 = arith.constant 0 : index
    %0 = vector.load %arg2[%c0, %c0_0, %c0_1, %c0_2] : memref<1x8x8x128xf32, #tpu.memory_space<vmem>>, vector<1x8x8x128xf32>
    %1 = vector.shape_cast %0 : vector<1x8x8x128xf32> to vector<8x8x128xf32>
    %c0_3 = arith.constant 0 : index
    %c0_4 = arith.constant 0 : index
    %c0_5 = arith.constant 0 : index
    %2 = vector.load %arg4[%c0_3, %c0_4, %c0_5] : memref<1x8x128xf32, #tpu.memory_space<vmem>>, vector<1x8x128xf32>
    %3 = vector.shape_cast %2 : vector<1x8x128xf32> to vector<8x128xf32>
    %4 = vector.shape_cast %3 : vector<8x128xf32> to vector<8x1x128xf32>
    %5 = vector.broadcast %4 : vector<8x1x128xf32> to vector<8x8x128xf32>
    %6 = arith.mulf %1, %5 : vector<8x8x128xf32>
    %c0_6 = arith.constant 0 : index
    %c0_7 = arith.constant 0 : index
    %c0_8 = arith.constant 0 : index
    %c0_9 = arith.constant 0 : index
    %7 = vector.load %arg3[%c0_6, %c0_7, %c0_8, %c0_9] : memref<1x8x8x128xf32, #tpu.memory_space<vmem>>, vector<1x8x8x128xf32>
    %8 = vector.shape_cast %7 : vector<1x8x8x128xf32> to vector<8x8x128xf32>
    %9 = arith.addf %6, %8 : vector<8x8x128xf32>
    %cst = arith.constant 0.000000e+00 : f32
    %10 = vector.broadcast %cst : f32 to vector<8x8x128xf32>
    %11 = arith.maximumf %9, %10 : vector<8x8x128xf32>
    %c0_10 = arith.constant 0 : index
    %c0_11 = arith.constant 0 : index
    %c0_12 = arith.constant 0 : index
    %c0_13 = arith.constant 0 : index
    %12 = vector.load %arg5[%c0_10, %c0_11, %c0_12, %c0_13] : memref<1x8x8x128xf32, #tpu.memory_space<vmem>>, vector<1x8x8x128xf32>
    %13 = vector.shape_cast %12 : vector<1x8x8x128xf32> to vector<8x8x128xf32>
    %14 = vector.shape_cast %11 : vector<8x8x128xf32> to vector<1x8x8x128xf32>
    tpu.vector_store %arg5[%c0_10, %c0_11, %c0_12, %c0_13], %14 {strides = array<i32>} : memref<1x8x8x128xf32, #tpu.memory_space<vmem>>, vector<1x8x8x128xf32>,
    return
  }
  func.func @transform_0(%arg0: i32, %arg1: i32) -> (i32, i32, i32, i32) {
    %c0_i32 = arith.constant 0 : i32
    %c0_i32_0 = arith.constant 0 : i32
    %c0_i32_1 = arith.constant 0 : i32
    return %arg0, %arg1, %c0_i32, %c0_i32_0 : i32, i32, i32, i32
  }
  func.func @transform_1(%arg0: i32, %arg1: i32) -> (i32, i32, i32, i32) {
    %c0_i32 = arith.constant 0 : i32
    %c0_i32_0 = arith.constant 0 : i32
    %c0_i32_1 = arith.constant 0 : i32
    return %arg0, %arg1, %c0_i32, %c0_i32_0 : i32, i32, i32, i32
  }
  func.func @transform_2(%arg0: i32, %arg1: i32) -> (i32, i32, i32) {
    %c0_i32 = arith.constant 0 : i32
    %c0_i32_0 = arith.constant 0 : i32
    return %arg0, %arg1, %c0_i32 : i32, i32, i32
  }
  func.func @transform_3(%arg0: i32, %arg1: i32) -> (i32, i32, i32, i32) {
    %c0_i32 = arith.constant 0 : i32
    %c0_i32_0 = arith.constant 0 : i32
    %c0_i32_1 = arith.constant 0 : i32
    return %arg0, %arg1, %c0_i32, %c0_i32_0 : i32, i32, i32, i32
  }
}

</mosaic_0001>

<bundles_post_ra>
// kernel: dase_basic_block.4
= control target key start
LH: loop header
LB: loop body
LE: loop exit
PB: predicated region body
PF: predicated region fallthrough
CT: control target
= control target key end

     0   :  { %s2642_s15 = smov 0   ;;  %s2644_s16 = smov 0   ;;  %s3215_s0 = inlined_call_operand.vmem [shape: bf16[2,10,10,10,16], index: 0, kind: input, shape index: {}]   ;;  %s3216_s1 = inlined_call_operand.vmem [shape: bf16[3,9,16,16], index: 1, kind: input, shape index: {}]   ;;  %s3217_s2 = inlined_call_operand.vmem [shape: f32[1,16], index: 2, kind: input, shape index: {}]   ;;  %s3218_s3 = inlined_call_operand.vmem [shape: f32[2,8,64,16], index: 3, kind: output, shape index: {0}]   ;;  %s3219_s4 = inlined_call_operand.vmem [shape: f32[2,8,1,16], index: 4, kind: output, shape index: {1}]  }
   0x1   :  { %3220 = sst [smem:[#allocation3_spill]] %s3215_s0  ;;  %s2646_s17 = smov 0  }
   0x2   :  { %s2648_s18 = smov 0   ;;  %s2650_s19 = smov 0  }
   0x3   :  { %s2652_s20 = smov 0   ;;  %s2654_s21 = smov 0  }
   0x4 LB: > { %s27_s22 = sadd.s32 1, %s2602_s18  ;;  %s30_s23 = sadd.s32 1, %s2606_s19  ;;  %s2614_s21 = sphi %s2654_s21, %s15_s21   ;;  %s2610_s20 = sphi %s2652_s20, %s3231_s20   ;;  %s2606_s19 = sphi %s2650_s19, %s3230_s19   ;;  %s2602_s18 = sphi %s2648_s18, %s3229_s18   ;;  %s2598_s17 = sphi %s2646_s17, %s3228_s17   ;;  %s2594_s16 = sphi %s2644_s16, %s3227_s16   ;;  %s2590_s15 = sphi %s2642_s15, %s3226_s15  }
   0x5   : > { %p28_p0 = scmp.ge.s32.totalorder %s27_s22, 3  ;;  %p2081_p1 = scmp.ge.s32.totalorder %s2614_s21, 1 }
   0x6   : > { %p208_p2 = scmp.lt.s32.totalorder %s2614_s21, 49  ;;  %s34_s24 = sadd.s32 1, %s2610_s20 }
   0x7   : > { %s3233_s22 = smov (%p28_p0, %s27_s22), 0  ;;  %s3235_s23 = smov (!%p28_p0, %s30_s23), %s2606_s19 }
   0x8   : > { %p209_p3 = pnand %p2081_p1, %p208_p2  ;;  %p32_p4 = scmp.ge.s32.totalorder %s3235_s23, 8 }
   0x9   : > { %s255_s25 = sadd.s32 (!%p209_p3), %s2590_s15, %s2594_s16  ;;  %p256_p6 = scmp.lt.s32.totalorder (!%p209_p3), %s2598_s17, 1 }
   0xa   : > { %s3237_s23 = smov (%p32_p4, %s3235_s23), 0  ;;  %s3239_s24 = smov (!%p32_p4, %s34_s24), %s2610_s20 }
   0xb   : > { %p36_p5 = scmp.ge.s32.totalorder %s3239_s24, 2  ;;  %212 = sbr.rel (%p209_p3) target bundleno = 384 (0x180), region = 32 }
   0xc   : > { %p258_p7 = scmp.lt.s32.totalorder (!%p209_p3), %s255_s25, 9  ;;  %p266_p8 = scmp.lt.s32.totalorder (!%p209_p3), %s2590_s15, 2 }
   0xd   : > { %s3241_s24 = smov (%p36_p5, %s3239_s24), 0  ;;  %p273_p9 = scmp.lt.s32.totalorder (!%p209_p3), %s2594_s16, 7 }
   0xe   : > { %s3221_s0 = sld [smem:[#allocation3_spill]] (!%p209_p3)  ;;  %p2088_p10 = scmp.ne.s32.totalorder (!%p209_p3), %s2590_s15, 0 }
  0x12   : > { %s3243_s17 = smov (!%p256_p6, %s2598_s17), 1  ;;  %s3245_s25 = smov (!%p258_p7, %s255_s25), 9 }
  0x13   : > { %s2480_s26 = smul.u32 200, %s3243_s17  ;;  %s2085_s9 = sshll.u32 %s3243_s17, 6  ;;  %vm292_vm0 = vcmask (!%p2088_p10), 130048   ;;  %v2616_v0 = vmov (!%p2088_p10), 0.0  }
  0x14   : > { %s2479_s27 = smul.u32 20, %s3245_s25  ;;  %s2087_s13 = sshll.u32 %s3243_s17, 3  ;;  %293 = vst.msk [vmem:[#allocation2] sm:$0xff] (!%p2088_p10), %vm292_vm0, %v2616_v0  ;;  %294 = vst.msk [vmem:[#allocation2 + $0x8] sm:$0xff] (!%p2088_p10), %vm292_vm0, %v2616_v0 }
  0x15   : > { %s267_s28 = scalar_select %p266_p8, %s2590_s15, 2 }
  0x16   : > { %s262_s29 = sadd.s32 %s2480_s26, %s2479_s27  ;;  %s3247_s16 = smov (!%p273_p9, %s2594_s16), 7  ;;  %295 = vst.msk [vmem:[#allocation2 + $0x10] sm:$0xff] (!%p2088_p10), %vm292_vm0, %v2616_v0  ;;  %296 = vst.msk [vmem:[#allocation2 + $0x18] sm:$0xff] (!%p2088_p10), %vm292_vm0, %v2616_v0 }
  0x17   : > { %s2082_s30 = sshll.u32 %s262_s29, 2  ;;  %s2481_s5 = smul.u32 72, %s267_s28  ;;  %297 = vst.msk [vmem:[#allocation2 + $0x20] sm:$0xff] (!%p2088_p10), %vm292_vm0, %v2616_v0  ;;  %298 = vst.msk [vmem:[#allocation2 + $0x28] sm:$0xff] (!%p2088_p10), %vm292_vm0, %v2616_v0 }
  0x18   : > { %s2696_s8 = scalar_lea.vmem %s3221_s0, %s2082_s30  ;;  %s2084_s14 = sshll.u32 %s3247_s16, 3  ;;  %299 = vst.msk [vmem:[#allocation2 + $0x30] sm:$0xff] (!%p2088_p10), %vm292_vm0, %v2616_v0  ;;  %300 = vst.msk [vmem:[#allocation2 + $0x38] sm:$0xff] (!%p2088_p10), %vm292_vm0, %v2616_v0 }
  0x19   : > { %s2701_s12 = scalar_lea.vmem %s3216_s1, %s2481_s5  ;;  %s2704_s25 = sadd.s32 %s2087_s13, %s3247_s16 }
  0x1a   : > { %s277_s26 = sadd.s32 %s2085_s9, %s2084_s14  ;;  %s286_s29 = scalar_lea.vmem %s3219_s4, %s2704_s25 }
  0x1b   : > { %s2086_s6 = sshll.u32 %s277_s26, 3  ;;  %291 = sbr.rel (%p2088_p10) target bundleno = 34 (0x22), region = 36 }
  0x1c   : > { %s2713_s0 = scalar_lea.vmem %s3218_s3, %s2086_s6 }
  0x22 PF: > { %v2539_v1 = vld [vmem:[%s2701_s12 + $0x8] sm:$0xff]   ;;  %v2718_v2 = vld [vmem:[%s2701_s12 + $0x20] sm:$0xff]   ;;  %vm319_vm1 = vsmask.f32 3328  ;;  %vm320_vm2 = vsmask.f32 7440 }
  0x23   : > { %2323 = vmatprep.subr.bf16.mxu1 %v2539_v1  ;;  %v2721_v3 = vld [vmem:[%s2696_s8] sm:$0xf]  ;;  %v2724_v4 = vld [vmem:[%s2696_s8 + $0x8] sm:$0xf]  ;;  %v2727_v5 = vld [vmem:[%s2696_s8 + $0x4] sm:$0x1]  ;;  %2363 = vmatprep.subr.bf16.mxu0 %v2718_v2 }
  0x24   : > { %2324 = vmatpush3.bf16.msra.mxu1 %v2539_v1  ;;  %v2731_v6 = vld [vmem:[%s2696_s8 + $0xc] sm:$0x1]  ;;  %2364 = vmatpush3.bf16.msra.mxu0 %v2718_v2  ;;  %v323_v7 = vshrl.u32 %v2721_v3, 16  ;;  %v326_v8 = vshll.u32 %v2721_v3, 16  ;;  %v332_v9 = vshll.u32 %v2727_v5, 16  ;;  %v337_v10 = vshrl.u32 %v2724_v4, 16  ;;  %vm2758_vm4 = vmor %vm319_vm1, %vm320_vm2 }
  0x25   : > { %v340_v11 = vshll.u32 %v2724_v4, 16  ;;  %v346_v12 = vshll.u32 %v2731_v6, 16  ;;  %vm455_vm3 = vcmask 130048   ;;  %v2741_v17 = vld [vmem:[%s2701_s12] sm:$0xff]   ;;  %v2744_v18 = vld [vmem:[%s2701_s12 + $0x28] sm:$0xff]   ;;  %vm660_vm5 = vcmask 1042432  }
  0x26   : > { %v325_v13 = vrot.slane %v323_v7, 4  ;;  %v328_v14 = vrot.slane %v326_v8, 5  ;;  %v334_v15 = vrot.slane %v332_v9, 5  ;;  %v339_v16 = vrot.slane %v337_v10, 4  ;;  %v2147_v21 = vld [vmem:[%s2696_s8 + $0x8] sm:$0xf]  ;;  %2333 = vmatprep.subr.bf16.mxu1 %v2741_v17  ;;  %2373 = vmatprep.subr.bf16.mxu0 %v2744_v18 }
  0x27   : > { %v342_v19 = vrot.slane %v340_v11, 5  ;;  %v348_v20 = vrot.slane %v346_v12, 5  ;;  %v2748_v22 = vld [vmem:[%s2696_s8 + $0xc] sm:$0x1]  ;;  %v2149_v24 = vld [vmem:[%s2696_s8 + $0x10] sm:$0xf] }
  0x28   : > { %v329_v23 = vor.u32 %v328_v14, %v325_v13  ;;  %v2753_v25 = vld [vmem:[%s2696_s8 + $0x14] sm:$0x1]  ;;  %v941_v26 = vshrl.u32 %v2147_v21, 16  ;;  %v944_v27 = vshll.u32 %v2147_v21, 16  ;;  %v950_v30 = vshll.u32 %v2748_v22, 16  ;;  %p2274_p11 = scmp.ne.s32.totalorder %s2590_s15, 2 }
  0x29   : > { %v343_v29 = vor.u32 %v342_v19, %v339_v16  ;;  %v955_v31 = vshrl.u32 %v2149_v24, 16  ;;  %v958_v32 = vshll.u32 %v2149_v24, 16  ;;  %v964_v36 = vshll.u32 %v2753_v25, 16  ;;  %v2765_v41 = vld [vmem:[%s2696_s8 + $0x10] sm:$0xf] }
  0x2a   : > { %v330_v33 = vrot.slane %v329_v23, 4  ;;  %v943_v34 = vrot.slane %v941_v26, 4  ;;  %v946_v35 = vrot.slane %v944_v27, 5  ;;  %v952_v38 = vrot.slane %v950_v30, 5  ;;  %v2771_v46 = vld [vmem:[%s2696_s8 + $0x18] sm:$0xf] }
  0x2b   : > { %v344_v37 = vrot.slane %v343_v29, 4  ;;  %v957_v39 = vrot.slane %v955_v31, 4  ;;  %v960_v40 = vrot.slane %v958_v32, 5  ;;  %v966_v44 = vrot.slane %v964_v36, 5  ;;  %v2774_v47 = vld [vmem:[%s2696_s8 + $0x14] sm:$0x1] }
  0x2c   : > { %v335_v42 = vsel %vm2758_vm4, %v330_v33, %v334_v15  ;;  %v947_v43 = vor.u32 %v946_v35, %v943_v34  ;;  %v1184_v45 = vrot.slane %v2748_v22, 5  ;;  %v1188_v50 = vrot.slane %v2753_v25, 5  ;;  %v2780_v51 = vld [vmem:[%s2696_s8 + $0x1c] sm:$0x1]  ;;  %v2151_v0 = vld [vmem:[%s2696_s8 + $0x18] sm:$0xf] }
  0x2d   : > { %v349_v48 = vsel %vm2758_vm4, %v344_v37, %v348_v20  ;;  %v961_v49 = vor.u32 %v960_v40, %v957_v39  ;;  %v351_v52 = vshrl.u32 %v2765_v41, 16  ;;  %v354_v55 = vshll.u32 %v2765_v41, 16  ;;  %v2793_v1 = vld [vmem:[%s2696_s8 + $0x1c] sm:$0x1]  ;;  %v2153_v10 = vld [vmem:[%s2696_s8 + $0x20] sm:$0xf] }
  0x2e   : > { %v2091_v53 = vcombine.low %v335_v42, %v349_v48  ;;  %v948_v54 = vrot.slane %v947_v43, 4  ;;  %v360_v56 = vshll.u32 %v2774_v47, 16  ;;  %v365_v59 = vshrl.u32 %v2771_v46, 16  ;;  %v2799_v11 = vld [vmem:[%s2696_s8 + $0x24] sm:$0x1] }
  0x2f   : > { %v962_v57 = vrot.slane %v961_v49, 4  ;;  %v353_v58 = vrot.slane %v351_v52, 4  ;;  %v368_v60 = vshll.u32 %v2771_v46, 16  ;;  %v356_v62 = vrot.slane %v354_v55, 5  ;;  %v2805_v29 = vld [vmem:[%s2696_s8 + $0x20] sm:$0xf] }
  0x30   : > { %2325 = vmatprep.mubr.msk.bf16.mxu1 %vm455_vm3, %v2091_v53  ;;  %v953_v61 = vsel %vm2758_vm4, %v948_v54, %v952_v38  ;;  %v374_v63 = vshll.u32 %v2780_v51, 16  ;;  %v367_v8 = vrot.slane %v365_v59, 4  ;;  %v362_v14 = vrot.slane %v360_v56, 5  ;;  %v2808_v34 = vld [vmem:[%s2696_s8 + $0x28] sm:$0xf]  ;;  %v2823_v49 = vld [vmem:[%s2701_s12 + $0x10] sm:$0xff]  }
  0x31   : > { %v967_v7 = vsel %vm2758_vm4, %v962_v57, %v966_v44  ;;  %v370_v9 = vrot.slane %v368_v60, 5  ;;  %v357_v13 = vor.u32 %v356_v62, %v353_v58  ;;  %v969_v19 = vshrl.u32 %v2151_v0, 16  ;;  %v2813_v39 = vld [vmem:[%s2696_s8 + $0x24] sm:$0x1]  ;;  %v2820_v48 = vld [vmem:[%s2696_s8 + $0x2c] sm:$0x1] }
  0x32   : > { %v2165_v12 = vcombine.low %v953_v61, %v967_v7  ;;  %v376_v15 = vrot.slane %v374_v63, 5  ;;  %v972_v20 = vshll.u32 %v2151_v0, 16  ;;  %v978_v21 = vshll.u32 %v2793_v1, 16  ;;  %v2828_v56 = vld [vmem:[%s2696_s8 + $0x30] sm:$0xf] }
  0x33   : > { %v371_v16 = vor.u32 %v370_v9, %v367_v8  ;;  %v358_v23 = vrot.slane %v357_v13, 4  ;;  %v983_v24 = vshrl.u32 %v2153_v10, 16  ;;  %v986_v26 = vshll.u32 %v2153_v10, 16  ;;  %v2834_v61 = vld [vmem:[%s2696_s8 + $0x38] sm:$0xf] }
  0x34   : > { %2365 = vmatprep.mubr.msk.bf16.mxu0 %vm455_vm3, %v2165_v12  ;;  %v992_v27 = vshll.u32 %v2799_v11, 16  ;;  %v971_v31 = vrot.slane %v969_v19, 4  ;;  %v974_v32 = vrot.slane %v972_v20, 5  ;;  %v980_v33 = vrot.slane %v978_v21, 5  ;;  %v2839_v8 = vld [vmem:[%s2696_s8 + $0x34] sm:$0x1] }
  0x35   : > { %v372_v30 = vrot.slane %v371_v16, 4  ;;  %v363_v35 = vsel %vm2758_vm4, %v358_v23, %v362_v14  ;;  %v985_v36 = vrot.slane %v983_v24, 4  ;;  %v988_v37 = vrot.slane %v986_v26, 5  ;;  %v2845_v14 = vld [vmem:[%s2696_s8 + $0x3c] sm:$0x1] }
  0x36   : > { %v994_v38 = vrot.slane %v992_v27, 5  ;;  %v975_v42 = vor.u32 %v974_v32, %v971_v31  ;;  %v1192_v43 = vrot.slane %v2793_v1, 5  ;;  %v1196_v44 = vrot.slane %v2799_v11, 5  ;;  %v2174_v27 = vld [vmem:[%s2696_s8 + $0x8] sm:$0xe] }
  0x37   : > { %v377_v40 = vsel %vm2758_vm4, %v372_v30, %v376_v15  ;;  %v989_v53 = vor.u32 %v988_v37, %v985_v36  ;;  %v379_v54 = vshrl.u32 %v2805_v29, 16  ;;  %v382_v55 = vshll.u32 %v2805_v29, 16  ;;  %v2848_v15 = vld [vmem:[%s2701_s12 + $0x30] sm:$0xff]   ;;  %v2176_v36 = vld [vmem:[%s2696_s8 + $0x18] sm:$0xe] }
  0x38   : > { %v2092_v52 = vcombine.low %v363_v35, %v377_v40  ;;  %v976_v57 = vrot.slane %v975_v42, 4  ;;  %v388_v58 = vshll.u32 %v2813_v39, 16  ;;  %v393_v59 = vshrl.u32 %v2808_v34, 16  ;;  %v2175_v30 = vld [vmem:[%s2696_s8 + $0x10] sm:$0xe] }
  0x39   : > { %v396_v60 = vshll.u32 %v2808_v34, 16  ;;  %v990_v62 = vrot.slane %v989_v53, 4  ;;  %v381_v63 = vrot.slane %v379_v54, 4  ;;  %v384_v0 = vrot.slane %v382_v55, 5 }
  0x3a   : > { %2326 = vmatmul.mubr.msk.bf16.vlgmr.msra.gmra.mrb[0].mxu1 %vm455_vm3, %v2092_v52  ;;  %v402_v7 = vshll.u32 %v2820_v48, 16  ;;  %v981_v9 = vsel %vm2758_vm4, %v976_v57, %v980_v33  ;;  %v390_v10 = vrot.slane %v388_v58, 5  ;;  %v395_v12 = vrot.slane %v393_v59, 4  ;;  %v2177_v52 = vld [vmem:[%s2696_s8 + $0x20] sm:$0xe] }
  0x3b   : > { %2334 = vmatpush3.bf16.msra.mxu1 %v2741_v17  ;;  %v398_v13 = vrot.slane %v396_v60, 5  ;;  %v995_v16 = vsel %vm2758_vm4, %v990_v62, %v994_v38  ;;  %v385_v19 = vor.u32 %v384_v0, %v381_v63  ;;  %v407_v17 = vshrl.u32 %v2828_v56, 16  ;;  %v2868_v57 = vld [vmem:[%s2696_s8 + $0x2c] sm:$0x1]  ;;  %v2879_v63 = vld [vmem:[%s2696_s8 + $0x34] sm:$0x1] }
  0x3c   : > { %v404_v20 = vrot.slane %v402_v7, 5  ;;  %2343 = vmatprep.subr.bf16.mxu1 %v2823_v49  ;;  %v2166_v21 = vcombine.low %v981_v9, %v995_v16  ;;  %v410_v24 = vshll.u32 %v2828_v56, 16  ;;  %v416_v26 = vshll.u32 %v2839_v8, 16  ;;  %v2178_v0 = vld [vmem:[%s2696_s8 + $0x28] sm:$0xe] }
  0x3d   : > { %v399_v23 = vor.u32 %v398_v13, %v395_v12  ;;  %v386_v31 = vrot.slane %v385_v19, 4  ;;  %v409_v32 = vrot.slane %v407_v17, 4  ;;  %v421_v33 = vshrl.u32 %v2834_v61, 16  ;;  %v2179_v13 = vld [vmem:[%s2696_s8 + $0x30] sm:$0xe] }
  0x3e   : > { %v424_v35 = vshll.u32 %v2834_v61, 16  ;;  %2366 = vmatmul.mubr.msk.bf16.vlgmr.msra.gmra.mrb[0].mxu0 %vm455_vm3, %v2166_v21  ;;  %v412_v38 = vrot.slane %v410_v24, 5  ;;  %v418_v40 = vrot.slane %v416_v26, 5  ;;  %v430_v42 = vshll.u32 %v2845_v14, 16  ;;  %v2888_v17 = vld [vmem:[%s2696_s8 + $0x3c] sm:$0x1] }
  0x3f   : > { %v400_v37 = vrot.slane %v399_v23, 4  ;;  %2374 = vmatpush3.bf16.msra.mxu0 %v2744_v18  ;;  %v391_v53 = vsel %vm2758_vm4, %v386_v31, %v390_v10  ;;  %v423_v54 = vrot.slane %v421_v33, 4  ;;  %vm661_vm6 = vcmask 1046532   ;;  %v2180_v21 = vld [vmem:[%s2696_s8 + $0x38] sm:$0xe] }
  0x40   : > { %v426_v55 = vrot.slane %v424_v35, 5  ;;  %v413_v59 = vor.u32 %v412_v38, %v409_v32  ;;  %v432_v60 = vrot.slane %v430_v42, 5  ;;  %vm2873_vm7 = vmor %vm660_vm5, %vm661_vm6  ;;  %v2182_v62 = vrot.slane %v2174_v27, 9  ;;  %2383 = vmatprep.subr.bf16.mxu0 %v2848_v15  ;;  %v2181_v23 = vld [vmem:[%s2696_s8 + $0x40] sm:$0xe] }
  0x41   : > { %v405_v58 = vsel %vm2758_vm4, %v400_v37, %v404_v20  ;;  %v2183_v10 = vrot.slane %v2175_v30, 9  ;;  %v2184_v12 = vrot.slane %v2176_v36, 9  ;;  %v2185_v20 = vrot.slane %v2177_v52, 9  ;;  %v2914_v33 = vld [vmem:[%s2696_s8 + $0x44] sm:$0x1] }
  0x42   : > { %v2093_v7 = vcombine.low %v391_v53, %v405_v58  ;;  %v427_v9 = vor.u32 %v426_v55, %v423_v54  ;;  %v414_v16 = vrot.slane %v413_v59, 4  ;;  %v1185_v19 = vsel %vm2873_vm7, %v2182_v62, %v1184_v45  ;;  %v636_v36 = vld [vmem:[%s2696_s8] sm:$0xe]  ;;  %v637_v37 = vld [vmem:[%s2696_s8 + $0x8] sm:$0xe]  ;;  %v2929_v55 = vld [vmem:[%s2701_s12 + $0x38] sm:$0xff]  }
  0x43   : > { %v1189_v26 = vsel %vm2873_vm7, %v2183_v10, %v1188_v50  ;;  %v1193_v22 = vsel %vm2873_vm7, %v2184_v12, %v1192_v43  ;;  %v2186_v45 = vrot.slane %v2178_v0, 9  ;;  %v1197_v25 = vsel %vm2873_vm7, %v2185_v20, %v1196_v44  ;;  %v638_v58 = vld [vmem:[%s2696_s8 + $0x10] sm:$0xe]  ;;  %v639_v59 = vld [vmem:[%s2696_s8 + $0x18] sm:$0xe] }
  0x44   : > { %2329 = vmatprep.mubr.msk.bf16.mxu1 %vm455_vm3, %v2093_v7  ;;  %v428_v24 = vrot.slane %v427_v9, 4  ;;  %v419_v27 = vsel %vm2758_vm4, %v414_v16, %v418_v40  ;;  %v2192_v30 = vcombine.low %v1185_v19, %v1189_v26  ;;  %v1200_v31 = vrot.slane %v2868_v57, 5  ;;  %v2947_v10 = vld [vmem:[%s2701_s12 + $0x18] sm:$0xff]   ;;  %v640_v16 = vld [vmem:[%s2696_s8 + $0x20] sm:$0xe] }
  0x45   : > { %v2100_v1 = vcombine.low %v2721_v3, %v2724_v4  ;;  %v2187_v43 = vrot.slane %v2179_v13, 9  ;;  %v1204_v32 = vrot.slane %v2879_v63, 5  ;;  %v2193_v11 = vcombine.low %v1193_v22, %v1197_v25  ;;  %v2964_v22 = vld [vmem:[%s2696_s8 + $0x38] sm:$0xe] }
  0x46   : > { %v433_v50 = vsel %vm2758_vm4, %v428_v24, %v432_v60  ;;  %2375 = vmatprep.mubr.msk.bf16.mxu0 %vm455_vm3, %v2192_v30  ;;  %v1201_v44 = vsel %vm2873_vm7, %v2186_v45, %v1200_v31  ;;  %v2188_v4 = vrot.slane %v2180_v21, 9  ;;  %v1208_v38 = vrot.slane %v2888_v17, 5  ;;  %v2220_v45 = vld [vmem:[%s2696_s8 + $0x10] sm:$0xf]  ;;  %v2222_v30 = vld [vmem:[%s2696_s8 + $0x18] sm:$0xf] }
  0x47   : > { %v2094_v35 = vcombine.low %v419_v27, %v433_v50  ;;  %v1205_v3 = vsel %vm2873_vm7, %v2187_v43, %v1204_v32  ;;  %v2189_v40 = vrot.slane %v2181_v23, 9  ;;  %v665_v42 = vrot.slane %v2727_v5, 5  ;;  %v2972_v27 = vld [vmem:[%s2696_s8 + $0x14] sm:$0x1]  ;;  %v2985_v31 = vld [vmem:[%s2696_s8 + $0x1c] sm:$0x1] }
  0x48   : > { %v669_v52 = vrot.slane %v2731_v6, 5  ;;  %v2194_v53 = vcombine.low %v1201_v44, %v1205_v3  ;;  %v1212_v54 = vrot.slane %v2914_v33, 5  ;;  %v1209_v5 = vsel %vm2873_vm7, %v2188_v4, %v1208_v38  ;;  %v2224_v32 = vld [vmem:[%s2696_s8 + $0x20] sm:$0xf]  ;;  %v2226_v38 = vld [vmem:[%s2696_s8 + $0x28] sm:$0xf] }
  0x49   : > { %2330 = vmatmul.mubr.msk.bf16.gmra.mrb[4].mxu1 %vm455_vm3, %v2094_v35  ;;  %v2109_v60 = vrot.slane %v636_v36, 9  ;;  %v2110_v62 = vrot.slane %v637_v37, 9  ;;  %v673_v0 = vrot.slane %v2774_v47, 5  ;;  %v677_v7 = vrot.slane %v2780_v51, 5  ;;  %v641_v47 = vld [vmem:[%s2696_s8 + $0x28] sm:$0xe] }
  0x4a   : > { %2335 = vmatprep.mubr.msk.bf16.mxu1 %vm455_vm3, %v2100_v1  ;;  %2376 = vmatmul.mubr.msk.bf16.vlgmr.msra.gmra.mrb[0].mxu0 %vm455_vm3, %v2193_v11  ;;  %v1213_v6 = vsel %vm2873_vm7, %v2189_v40, %v1212_v54  ;;  %v2101_v9 = vcombine.low %v2765_v41, %v2771_v46  ;;  %v2111_v12 = vrot.slane %v638_v58, 9  ;;  %v2112_v13 = vrot.slane %v639_v59, 9  ;;  %v2956_v46 = vld [vmem:[%s2696_s8 + $0x30] sm:$0xe]  ;;  %v2999_v36 = vld [vmem:[%s2696_s8 + $0x24] sm:$0x1] }
  0x4b   : > { %2384 = vmatpush3.bf16.msra.mxu0 %v2848_v15  ;;  %2379 = vmatprep.mubr.msk.bf16.mxu0 %vm455_vm3, %v2194_v53  ;;  %v2195_v19 = vcombine.low %v1209_v5, %v1213_v6  ;;  %v2102_v51 = vcombine.low %v2805_v29, %v2808_v34  ;;  %v2549_v15 = vld [vmem:[%s2696_s8 + $0x10] ss:$8 sps:$4 sm:$0xff]   ;;  %v2113_v20 = vrot.slane %v640_v16, 9  ;;  %v681_v41 = vrot.slane %v2813_v39, 5  ;;  %v3011_v58 = vld [vmem:[%s2696_s8 + $0x2c] sm:$0x1] }
  0x4c   : > { %2393 = vmatprep.subr.bf16.mxu0 %v2929_v55  ;;  %v666_v21 = vsel %vm2873_vm7, %v2109_v60, %v665_v42  ;;  %v670_v23 = vsel %vm2873_vm7, %v2110_v62, %v669_v52  ;;  %v2114_v24 = vrot.slane %v641_v47, 9  ;;  %v685_v26 = vrot.slane %v2820_v48, 5  ;;  %v2551_v42 = vld [vmem:[%s2696_s8 + $0x20] ss:$8 sps:$4 sm:$0xff]  }
  0x4d   : > { %v2103_v29 = vcombine.low %v2828_v56, %v2834_v61  ;;  %v2115_v34 = vrot.slane %v2956_v46, 9  ;;  %v689_v39 = vrot.slane %v2839_v8, 5  ;;  %v2978_v25 = vsel %vm2873_vm7, %v2111_v12, %v673_v0  ;;  %v2553_v12 = vld [vmem:[%s2696_s8 + $0x30] ss:$8 sps:$4 sm:$0xff]  }
  0x4e   : > { %v2982_v48 = vsel %vm2873_vm7, %v2112_v13, %v677_v7  ;;  %v1460_v56 = vshrl.u32 %v2220_v45, 16  ;;  %v1463_v61 = vshll.u32 %v2220_v45, 16  ;;  %v2119_v8 = vcombine.low %v666_v21, %v670_v23 }
  0x4f   : > { %v2991_v50 = vsel %vm2873_vm7, %v2113_v20, %v681_v41  ;;  %v1469_v1 = vshll.u32 %v2972_v27, 16  ;;  %v1474_v43 = vshrl.u32 %v2222_v30, 16  ;;  %v1477_v44 = vshll.u32 %v2222_v30, 16  ;;  %v2230_v30 = vld [vmem:[%s2696_s8 + $0x38] sm:$0xf] }
  0x50   : > { %v1462_v35 = vrot.slane %v1460_v56, 4  ;;  %v1465_v11 = vrot.slane %v1463_v61, 5  ;;  %v693_v37 = vrot.slane %v2845_v14, 5  ;;  %v1483_v4 = vshll.u32 %v2985_v31, 16 }
  0x51   : > { %2336 = vmatmul.mubr.msk.bf16.vlgmr.msra.gmra.mrb[0].mxu1 %vm455_vm3, %v2101_v9  ;;  %v1476_v3 = vrot.slane %v1474_v43, 4  ;;  %v1488_v40 = vshrl.u32 %v2224_v32, 16  ;;  %v3008_v52 = vsel %vm2873_vm7, %v2114_v24, %v685_v26  ;;  %v1479_v54 = vrot.slane %v1477_v44, 5  ;;  %v2228_v24 = vld [vmem:[%s2696_s8 + $0x30] sm:$0xf] }
  0x52   : > { %2344 = vmatpush3.bf16.msra.mxu1 %v2823_v49  ;;  %2339 = vmatprep.mubr.msk.bf16.mxu1 %vm455_vm3, %v2102_v51  ;;  %v2116_v49 = vrot.slane %v2964_v22, 9  ;;  %v1466_v53 = vor.u32 %v1465_v11, %v1462_v35  ;;  %v1491_v59 = vshll.u32 %v2224_v32, 16  ;;  %v1471_v5 = vrot.slane %v1469_v1, 5  ;;  %v2232_v32 = vld [vmem:[%s2696_s8 + $0x40] sm:$0xf] }
  0x53   : > { %2380 = vmatmul.mubr.msk.bf16.gmra.mrb[4].mxu0 %vm455_vm3, %v2195_v19  ;;  %2353 = vmatprep.subr.bf16.mxu1 %v2947_v10  ;;  %v1490_v6 = vrot.slane %v1488_v40, 4  ;;  %v1502_v14 = vshrl.u32 %v2226_v38, 16  ;;  %v1505_v60 = vshll.u32 %v2226_v38, 16  ;;  %v1480_v0 = vor.u32 %v1479_v54, %v1476_v3 }
  0x54   : > { %2385 = vmatprep.mubr.msk.bf16.mxu0 %vm455_vm3, %v2549_v15  ;;  %v1467_v62 = vrot.slane %v1466_v53, 4  ;;  %v1493_v7 = vrot.slane %v1491_v59, 5  ;;  %v1497_v9 = vshll.u32 %v2999_v36, 16  ;;  %v1485_v13 = vrot.slane %v1483_v4, 5  ;;  %v3018_v15 = vld [vmem:[%s2701_s12 + $0x40] sm:$0xff]  }
  0x55   : > { %v1504_v16 = vrot.slane %v1502_v14, 4  ;;  %v1507_v47 = vrot.slane %v1505_v60, 5  ;;  %v1511_v19 = vshll.u32 %v3011_v58, 16  ;;  %v1481_v51 = vrot.slane %v1480_v0, 4 }
  0x56   : > { %v1494_v20 = vor.u32 %v1493_v7, %v1490_v6  ;;  %v2120_v41 = vcombine.low %v2978_v25, %v2982_v48  ;;  %v2121_v46 = vcombine.low %v2991_v50, %v3008_v52  ;;  %v3027_v21 = vsel %vm2873_vm7, %v2115_v34, %v689_v39  ;;  %v3048_v48 = vld [vmem:[%s2696_s8 + $0x3c] sm:$0x1]  ;;  %v3062_v52 = vld [vmem:[%s2696_s8 + $0x4c] sm:$0x1] }
  0x57   : > { %v1508_v23 = vor.u32 %v1507_v47, %v1504_v16  ;;  %v3033_v26 = vsel %vm2873_vm7, %v2116_v49, %v693_v37  ;;  %v1472_v22 = vsel %vm2758_vm4, %v1467_v62, %v1471_v5  ;;  %v3037_v45 = vrot.slane %v1497_v9, 5  ;;  %v3056_v37 = vld [vmem:[%s2696_s8 + $0x44] sm:$0x1] }
  0x58   : > { %v1516_v34 = vshrl.u32 %v2228_v24, 16  ;;  %v1486_v39 = vsel %vm2758_vm4, %v1481_v51, %v1485_v13  ;;  %v1513_v25 = vrot.slane %v1511_v19, 5  ;;  %v1519_v56 = vshll.u32 %v2228_v24, 16  ;;  %v2247_v24 = vld [vmem:[%s2696_s8 + $0x10] sm:$0xe] }
  0x59   : > { %2340 = vmatmul.mubr.msk.bf16.gmra.mrb[4].mxu1 %vm455_vm3, %v2103_v29  ;;  %v3040_v29 = vld [vmem:[%s2696_s8 + $0x34] sm:$0x1]  ;;  %v1495_v50 = vrot.slane %v1494_v20, 4  ;;  %v1533_v43 = vshll.u32 %v2230_v30, 16  ;;  %v1509_v49 = vrot.slane %v1508_v23, 4  ;;  %v1539_v44 = vshll.u32 %v3048_v48, 16 }
  0x5a   : > { %2345 = vmatprep.mubr.msk.bf16.mxu1 %vm455_vm3, %v2119_v8  ;;  %v1525_v61 = vshll.u32 %v3040_v29, 16  ;;  %v2554_v8 = vld [vmem:[%s2696_s8 + $0x40] ss:$8 sps:$4 sm:$0xff]   ;;  %v1518_v1 = vrot.slane %v1516_v34, 4  ;;  %v1521_v35 = vrot.slane %v1519_v56, 5  ;;  %v2122_v3 = vcombine.low %v3027_v21, %v3033_v26 }
  0x5b   : > { %2386 = vmatmul.mubr.msk.bf16.vlgmr.msra.gmra.mrb[0].mxu0 %vm455_vm3, %v2551_v42  ;;  %v2238_v4 = vcombine.low %v1472_v22, %v1486_v39  ;;  %v1535_v40 = vrot.slane %v1533_v43, 5  ;;  %v2234_v42 = vld [vmem:[%s2696_s8 + $0x48] sm:$0xf]  ;;  %v1541_v54 = vrot.slane %v1539_v44, 5  ;;  %v1544_v59 = vshrl.u32 %v2232_v32, 16 }
  0x5c   : > { %2394 = vmatpush3.bf16.msra.mxu0 %v2929_v55  ;;  %2389 = vmatprep.mubr.msk.bf16.mxu0 %vm455_vm3, %v2553_v12  ;;  %v1530_v55 = vshrl.u32 %v2230_v30, 16  ;;  %v1527_v11 = vrot.slane %v1525_v61, 5  ;;  %v1522_v53 = vor.u32 %v1521_v35, %v1518_v1  ;;  %v1547_v5 = vshll.u32 %v2232_v32, 16  ;;  %v2248_v26 = vld [vmem:[%s2696_s8 + $0x18] sm:$0xe] }
  0x5d   : > { %2403 = vmatprep.subr.bf16.mxu0 %v3018_v15  ;;  %v1553_v14 = vshll.u32 %v3056_v37, 16  ;;  %v1558_v60 = vshrl.u32 %v2234_v42, 16  ;;  %v1561_v62 = vshll.u32 %v2234_v42, 16  ;;  %v1546_v7 = vrot.slane %v1544_v59, 4  ;;  %v2556_v22 = vld [vmem:[%s2696_s8 + $0x8] ss:$8 sps:$4 sm:$0xff]  }
  0x5e   : > { %v1532_v38 = vrot.slane %v1530_v55, 4  ;;  %v1523_v0 = vrot.slane %v1522_v53, 4  ;;  %v1549_v9 = vrot.slane %v1547_v5, 5  ;;  %v1567_v12 = vshll.u32 %v3062_v52, 16  ;;  %v2155_v56 = vld [vmem:[%s2696_s8 + $0x28] sm:$0xf] }
  0x5f   : > { %v1560_v16 = vrot.slane %v1558_v60, 4  ;;  %v1563_v47 = vrot.slane %v1561_v62, 5  ;;  %v1703_v19 = vrot.slane %v2972_v27, 5  ;;  %v1514_v51 = vsel %vm2758_vm4, %v1509_v49, %v1513_v25  ;;  %v2249_v43 = vld [vmem:[%s2696_s8 + $0x20] sm:$0xe] }
  0x60   : > { %v1536_v6 = vor.u32 %v1535_v40, %v1532_v38  ;;  %v1550_v20 = vor.u32 %v1549_v9, %v1546_v7  ;;  %v1555_v21 = vrot.slane %v1553_v14, 5  ;;  %v1569_v30 = vrot.slane %v1567_v12, 5  ;;  %v2250_v32 = vld [vmem:[%s2696_s8 + $0x28] sm:$0xe]  ;;  %v2251_v38 = vld [vmem:[%s2696_s8 + $0x30] sm:$0xe] }
  0x61   : > { %2346 = vmatmul.mubr.msk.bf16.vlgmr.msra.gmra.mrb[0].mxu1 %vm455_vm3, %v2120_v41  ;;  %v1707_v41 = vrot.slane %v2985_v31, 5  ;;  %v1564_v23 = vor.u32 %v1563_v47, %v1560_v16  ;;  %v2255_v34 = vrot.slane %v2247_v24, 9  ;;  %v2256_v39 = vrot.slane %v2248_v26, 9  ;;  %v2557_v40 = vld [vmem:[%s2696_s8 + $0x18] ss:$8 sps:$4 sm:$0xff]  }
  0x62   : > { %2354 = vmatpush3.bf16.msra.mxu1 %v2947_v10  ;;  %2349 = vmatprep.mubr.msk.bf16.mxu1 %vm455_vm3, %v2121_v46  ;;  %v1537_v13 = vrot.slane %v1536_v6, 4  ;;  %v1500_v10 = vsel %vm2758_vm4, %v1495_v50, %v3037_v45  ;;  %v1528_v46 = vsel %vm2758_vm4, %v1523_v0, %v1527_v11  ;;  %v1551_v45 = vrot.slane %v1550_v20, 4  ;;  %v2161_v60 = vld [vmem:[%s2696_s8 + $0x40] sm:$0xf]  ;;  %v2252_v9 = vld [vmem:[%s2696_s8 + $0x38] sm:$0xe] }
  0x63   : > { %2390 = vmatmul.mubr.msk.bf16.gmra.mrb[4].mxu0 %vm455_vm3, %v2554_v8  ;;  %2413 = vmatprep.subr.bf16.mxu1 %v2718_v2  ;;  %v2239_v25 = vcombine.low %v1500_v10, %v1514_v51  ;;  %v1565_v31 = vrot.slane %v1564_v23, 4  ;;  %v2157_v8 = vld [vmem:[%s2696_s8 + $0x30] sm:$0xf]  ;;  %v997_v50 = vshrl.u32 %v2155_v56, 16  ;;  %v1704_v1 = vsel %vm2873_vm7, %v2255_v34, %v1703_v19 }
  0x64   : > { %2395 = vmatprep.mubr.msk.bf16.mxu0 %vm455_vm3, %v2238_v4  ;;  %v1542_v27 = vsel %vm2758_vm4, %v1537_v13, %v1541_v54  ;;  %v1708_v55 = vsel %vm2873_vm7, %v2256_v39, %v1707_v41  ;;  %v1711_v49 = vrot.slane %v2999_v36, 5  ;;  %v1006_v35 = vshll.u32 %v2868_v57, 16  ;;  %v2159_v54 = vld [vmem:[%s2696_s8 + $0x38] sm:$0xf]  ;;  %v2558_v12 = vld [vmem:[%s2696_s8 + $0x28] ss:$8 sps:$4 sm:$0xff]  }
  0x65   : > { %v2240_v61 = vcombine.low %v1528_v46, %v1542_v27  ;;  %v1556_v11 = vsel %vm2758_vm4, %v1551_v45, %v1555_v21  ;;  %v1570_v44 = vsel %vm2758_vm4, %v1565_v31, %v1569_v30  ;;  %v1000_v4 = vshll.u32 %v2155_v56, 16  ;;  %v2559_v39 = vld [vmem:[%s2696_s8 + $0x38] ss:$8 sps:$4 sm:$0xff]   ;;  %v2254_v31 = vld [vmem:[%s2696_s8 + $0x48] sm:$0xe] }
  0x66   : > { %v1715_v42 = vrot.slane %v3011_v58, 5  ;;  %v1011_v36 = vshrl.u32 %v2157_v8, 16  ;;  %v1014_v57 = vshll.u32 %v2157_v8, 16  ;;  %v1020_v53 = vshll.u32 %v2879_v63, 16 }
  0x67   : > { %v2265_v59 = vcombine.low %v1704_v1, %v1708_v55  ;;  %v2257_v5 = vrot.slane %v2249_v43, 9  ;;  %v2258_v6 = vrot.slane %v2250_v32, 9  ;;  %v1002_v14 = vrot.slane %v1000_v4, 5 }
  0x68   : > { %v2241_v62 = vcombine.low %v1556_v11, %v1570_v44  ;;  %v1008_v0 = vrot.slane %v1006_v35, 5  ;;  %v1013_v7 = vrot.slane %v1011_v36, 4  ;;  %v1016_v58 = vrot.slane %v1014_v57, 5 }
  0x69   : > { %2350 = vmatmul.mubr.msk.bf16.gmra.mrb[4].mxu1 %vm455_vm3, %v2122_v3  ;;  %v999_v3 = vrot.slane %v997_v50, 4  ;;  %v2259_v16 = vrot.slane %v2251_v38, 9  ;;  %v1025_v47 = vshrl.u32 %v2159_v54, 16  ;;  %v1028_v63 = vshll.u32 %v2159_v54, 16 }
  0x6a   : > { %2355 = vmatprep.mubr.msk.bf16.mxu1 %vm455_vm3, %v2556_v22  ;;  %v1017_v19 = vor.u32 %v1016_v58, %v1013_v7  ;;  %v1022_v10 = vrot.slane %v1020_v53, 5  ;;  %v1042_v51 = vshll.u32 %v2161_v60, 16  ;;  %v1719_v41 = vrot.slane %v3040_v29, 5 }
  0x6b   : > { %2396 = vmatmul.mubr.msk.bf16.vlgmr.msra.gmra.mrb[0].mxu0 %vm455_vm3, %v2239_v25  ;;  %v1003_v13 = vor.u32 %v1002_v14, %v999_v3  ;;  %v2260_v46 = vrot.slane %v2252_v9, 9  ;;  %v1723_v27 = vrot.slane %v3048_v48, 5  ;;  %v1027_v23 = vrot.slane %v1025_v47, 4  ;;  %v2253_v25 = vld [vmem:[%s2696_s8 + $0x40] sm:$0xe]  ;;  %v1840_v9 = vld [vmem:[#allocation2 + $0x8] sm:$0xff] }
  0x6c   : > { %2404 = vmatpush3.bf16.msra.mxu0 %v3018_v15  ;;  %2399 = vmatprep.mubr.msk.bf16.mxu0 %vm455_vm3, %v2240_v61  ;;  %v1039_v15 = vshrl.u32 %v2161_v60, 16  ;;  %v1018_v21 = vrot.slane %v1017_v19, 4  ;;  %v1030_v24 = vrot.slane %v1028_v63, 5  ;;  %v1044_v22 = vrot.slane %v1042_v51, 5  ;;  %v1839_v14 = vld [vmem:[#allocation2] sm:$0xff] }
  0x6d   : > { %v1004_v20 = vrot.slane %v1003_v13, 4  ;;  %v1034_v45 = vshll.u32 %v2888_v17, 16  ;;  %v1716_v30 = vsel %vm2873_vm7, %v2258_v6, %v1715_v42  ;;  %v1720_v34 = vsel %vm2873_vm7, %v2259_v16, %v1719_v41 }
  0x6e   : > { %v1041_v26 = vrot.slane %v1039_v15, 4  ;;  %v1023_v48 = vsel %vm2758_vm4, %v1018_v21, %v1022_v10  ;;  %v1724_v17 = vsel %vm2873_vm7, %v2260_v46, %v1723_v27  ;;  %v1048_v56 = vshll.u32 %v2914_v33, 16  ;;  %v1845_v15 = vld [vmem:[#allocation2 + $0x30] sm:$0xff]  ;;  %v1843_v46 = vld [vmem:[#allocation2 + $0x20] sm:$0xff] }
  0x6f   : > { %v1009_v29 = vsel %vm2758_vm4, %v1004_v20, %v1008_v0  ;;  %v1031_v8 = vor.u32 %v1030_v24, %v1027_v23  ;;  %v2267_v55 = vcombine.low %v1720_v34, %v1724_v17  ;;  %v2261_v43 = vrot.slane %v2253_v25, 9  ;;  %v1842_v0 = vld [vmem:[#allocation2 + $0x18] sm:$0xff] }
  0x70   : > { %v2167_v61 = vcombine.low %v1009_v29, %v1023_v48  ;;  %v1045_v50 = vor.u32 %v1044_v22, %v1041_v26  ;;  %v1727_v32 = vrot.slane %v3056_v37, 5  ;;  %v1731_v35 = vrot.slane %v3062_v52, 5  ;;  %v1846_v24 = vld [vmem:[#allocation2 + $0x38] sm:$0xff]  ;;  %v1844_v29 = vld [vmem:[#allocation2 + $0x28] sm:$0xff] }
  0x71   : > { %2356 = vmatmul.mubr.msk.bf16.vlgmr.msra.gmra.mrb[0].mxu1 %vm455_vm3, %v2557_v40  ;;  %v1036_v11 = vrot.slane %v1034_v45, 5  ;;  %v1050_v44 = vrot.slane %v1048_v56, 5  ;;  %v1032_v3 = vrot.slane %v1031_v8, 4  ;;  %vm1921_vm8 = vcmask (!%p2274_p11), 122880  }
  0x72   : > { %2414 = vmatpush3.bf16.msra.mxu1 %v2718_v2  ;;  %2359 = vmatprep.mubr.msk.bf16.mxu1 %vm455_vm3, %v2558_v12  ;;  %v1712_v2 = vsel %vm2873_vm7, %v2257_v5, %v1711_v49  ;;  %v2262_v49 = vrot.slane %v2254_v31, 9  ;;  %v1046_v4 = vrot.slane %v1045_v50, 4  ;;  %v1728_v33 = vsel %vm2873_vm7, %v2261_v43, %v1727_v32  ;;  %v1841_v5 = vld [vmem:[#allocation2 + $0x10] sm:$0xff] }
  0x73   : > { %2400 = vmatmul.mubr.msk.bf16.gmra.mrb[4].mxu0 %vm455_vm3, %v2241_v62  ;;  %v2266_v1 = vcombine.low %v1712_v2, %v1716_v30  ;;  %v1037_v52 = vsel %vm2758_vm4, %v1032_v3, %v1036_v11 }
  0x74   : > { %2405 = vmatprep.mubr.msk.bf16.mxu0 %vm455_vm3, %v2265_v59  ;;  %v1732_v37 = vsel %vm2873_vm7, %v2262_v49, %v1731_v35  ;;  %v1051_v38 = vsel %vm2758_vm4, %v1046_v4, %v1050_v44 }
  0x75   : > { %v2268_v40 = vcombine.low %v1728_v33, %v1732_v37  ;;  %v2168_v42 = vcombine.low %v1037_v52, %v1051_v38 }
  0x79   : > { %2360 = vmatmul.mubr.msk.bf16.gmra.mrb[4].mxu1 %vm455_vm3, %v2559_v39  ;;  %v2275_v39 = vld [vmem:[%s3217_s2] ss:$0 sm:$0xff] (!%p2274_p11) }
  0x7a   : > { %2369 = vmatprep.mubr.msk.bf16.mxu1 %vm455_vm3, %v2167_v61 }
  0x7b   : > { %2406 = vmatmul.mubr.msk.bf16.vlgmr.msra.gmra.mrb[0].mxu0 %vm455_vm3, %v2266_v1 }
  0x7c   : > { %2409 = vmatprep.mubr.msk.bf16.mxu0 %vm455_vm3, %v2267_v55 }
  0x83   : > { %2410 = vmatmul.mubr.msk.bf16.gmra.mrb[4].mxu0 %vm455_vm3, %v2268_v40 }
  0x85   : > { %2370 = vmatmul.mubr.msk.bf16.vlgmr.msra.gmra.mrb[4].mxu1 %vm455_vm3, %v2168_v42 }
 0x144   : > { %v2357_v36 = vpop.f32.mrb[0].mxu1 }
 0x145   : > { %v885_v57 = vpop.f32.mrb[1].mxu1 }
 0x146   : > { %v2358_v53 = vpop.f32.mrb[2].mxu1 }
 0x147   : > { %v888_v54 = vpop.f32.mrb[3].mxu1 }
 0x14e   : > { %v2407_v59 = vpop.f32.mrb[0].mxu0 }
 0x14f   : > { %v2415_v18 = vadd.f32 %v2407_v59, %v2357_v36  ;;  %v1800_v6 = vpop.f32.mrb[1].mxu0 }
 0x150   : > { %v2416_v60 = vadd.f32 %v1800_v6, %v885_v57  ;;  %v2408_v62 = vpop.f32.mrb[2].mxu0 }
 0x151   : > { %v1849_v28 = vadd.f32 %v2415_v18, %v1841_v5  ;;  %v2417_v7 = vadd.f32 %v2408_v62, %v2358_v53  ;;  %v1803_v58 = vpop.f32.mrb[3].mxu0 }
 0x152   : > { %v1847_v12 = vadd.f32 %v2416_v60, %v1839_v14  ;;  %v2418_v13 = vadd.f32 %v1803_v58, %v888_v54 }
 0x153   : > { %1857 = vst.msk [vmem:[#allocation2 + $0x10] sm:$0xff] %vm455_vm3, %v1849_v28  ;;  %v1850_v16 = vadd.f32 %v2417_v7, %v1842_v0 }
 0x154   : > { %1855 = vst.msk [vmem:[#allocation2] sm:$0xff] %vm455_vm3, %v1847_v12  ;;  %v1848_v47 = vadd.f32 %v2418_v13, %v1840_v9 }
 0x155   : > { %1858 = vst.msk [vmem:[#allocation2 + $0x18] sm:$0xff] %vm455_vm3, %v1850_v16 }
 0x156   : > { %1856 = vst.msk [vmem:[#allocation2 + $0x8] sm:$0xff] %vm455_vm3, %v1848_v47  ;;  %v2411_v63 = vpop.f32.mrb[4].mxu0 }
 0x157   : > { %v1816_v19 = vpop.f32.mrb[5].mxu0 }
 0x158   : > { %v2371_v10 = vpop.f32.mrb[4].mxu1  ;;  %v2412_v51 = vpop.f32.mrb[6].mxu0 }
 0x159   : > { %v2419_v20 = vadd.f32 %v2411_v63, %v2371_v10  ;;  %v1135_v41 = vpop.f32.mrb[5].mxu1  ;;  %v1819_v27 = vpop.f32.mrb[7].mxu0 }
 0x15a   : > { %v2420_v21 = vadd.f32 %v1816_v19, %v1135_v41  ;;  %v2372_v23 = vpop.f32.mrb[6].mxu1  ;;  %1866 = sbr.rel (%p2274_p11) target bundleno = 384 (0x180), region = 40  ;;  %v1869_v61 = vld [vmem:[#allocation2 + $0x10] sm:$0xff] (!%p2274_p11) }
 0x15b   : > { %v1853_v26 = vadd.f32 %v2419_v20, %v1845_v15  ;;  %v2421_v22 = vadd.f32 %v2412_v51, %v2372_v23  ;;  %v1138_v45 = vpop.f32.mrb[7].mxu1  ;;  %v1867_v17 = vld [vmem:[#allocation2] sm:$0xff] (!%p2274_p11)  ;;  %v1884_v1 = vadd.f32 (!%p2274_p11), %v2275_v39, %v1869_v61 }
 0x15c   : > { %v1851_v48 = vadd.f32 %v2420_v21, %v1843_v46  ;;  %v2422_v2 = vadd.f32 %v1819_v27, %v1138_v45  ;;  %v1882_v31 = vadd.f32 (!%p2274_p11), %v2275_v39, %v1867_v17  ;;  %v1870_v8 = vld [vmem:[#allocation2 + $0x18] sm:$0xff] (!%p2274_p11) }
 0x15d   : > { %1861 = vst.msk [vmem:[#allocation2 + $0x30] sm:$0xff] %vm455_vm3, %v1853_v26  ;;  %v1854_v30 = vadd.f32 %v2421_v22, %v1846_v24  ;;  %v1868_v25 = vld [vmem:[#allocation2 + $0x8] sm:$0xff] (!%p2274_p11)  ;;  %v1885_v55 = vadd.f32 (!%p2274_p11), %v2275_v39, %v1870_v8  ;;  %1892 = vst.msk [vmem:[%s2713_s0 + $0x10] sm:$0xff] (!%p2274_p11), %vm455_vm3, %v1884_v1  ;;  %v1901_v37 = vsel (!%p2274_p11), %vm455_vm3, %v1884_v1, 0.0 }
 0x15e   : > { %1859 = vst.msk [vmem:[#allocation2 + $0x20] sm:$0xff] %vm455_vm3, %v1851_v48  ;;  %v1852_v34 = vadd.f32 %v2422_v2, %v1844_v29  ;;  %v1883_v56 = vadd.f32 (!%p2274_p11), %v2275_v39, %v1868_v25  ;;  %1890 = vst.msk [vmem:[%s2713_s0] sm:$0xff] (!%p2274_p11), %vm455_vm3, %v1882_v31  ;;  %v1898_v11 = vsel (!%p2274_p11), %vm455_vm3, %v1882_v31, 0.0 }
 0x15f   : > { %1862 = vst.msk [vmem:[#allocation2 + $0x38] sm:$0xff] %vm455_vm3, %v1854_v30  ;;  %1893 = vst.msk [vmem:[%s2713_s0 + $0x18] sm:$0xff] (!%p2274_p11), %vm455_vm3, %v1885_v55  ;;  %v1903_v52 = vsel (!%p2274_p11), %vm455_vm3, %v1885_v55, 0.0 }
 0x160   : > { %1860 = vst.msk [vmem:[#allocation2 + $0x28] sm:$0xff] %vm455_vm3, %v1852_v34  ;;  %1891 = vst.msk [vmem:[%s2713_s0 + $0x8] sm:$0xff] (!%p2274_p11), %vm455_vm3, %v1883_v56  ;;  %v1899_v44 = vsel (!%p2274_p11), %vm455_vm3, %v1883_v56, 0.0 }
 0x161   : > { %v1900_v33 = vadd.f32 %v1899_v44, %v1898_v11 }
 0x163   : > { %v1902_v40 = vadd.f32 %v1901_v37, %v1900_v33 }
 0x164   : > { %v1873_v49 = vld [vmem:[#allocation2 + $0x30] sm:$0xff] }
 0x165   : > { %v1871_v50 = vld [vmem:[#allocation2 + $0x20] sm:$0xff]  ;;  %v1888_v4 = vadd.f32 %v2275_v39, %v1873_v49  ;;  %v1904_v36 = vadd.f32 %v1903_v52, %v1902_v40 }
 0x166   : > { %v1886_v43 = vadd.f32 %v2275_v39, %v1871_v50  ;;  %v1874_v35 = vld [vmem:[#allocation2 + $0x38] sm:$0xff] }
 0x167   : > { %v1872_v32 = vld [vmem:[#allocation2 + $0x28] sm:$0xff]  ;;  %1896 = vst.msk [vmem:[%s2713_s0 + $0x30] sm:$0xff] %vm455_vm3, %v1888_v4  ;;  %v1889_v38 = vadd.f32 %v2275_v39, %v1874_v35  ;;  %v1909_v54 = vsel %vm455_vm3, %v1888_v4, 0.0 }
 0x168   : > { %v1887_v3 = vadd.f32 %v2275_v39, %v1872_v32  ;;  %1894 = vst.msk [vmem:[%s2713_s0 + $0x20] sm:$0xff] %vm455_vm3, %v1886_v43  ;;  %v1905_v42 = vsel %vm455_vm3, %v1886_v43, 0.0 }
 0x169   : > { %1897 = vst.msk [vmem:[%s2713_s0 + $0x38] sm:$0xff] %vm455_vm3, %v1889_v38  ;;  %v1906_v53 = vadd.f32 %v1905_v42, %v1904_v36  ;;  %v1911_v5 = vsel %vm455_vm3, %v1889_v38, 0.0 }
 0x16a   : > { %1895 = vst.msk [vmem:[%s2713_s0 + $0x28] sm:$0xff] %vm455_vm3, %v1887_v3  ;;  %v1907_v57 = vsel %vm455_vm3, %v1887_v3, 0.0 }
 0x16b   : > { %v1908_v59 = vadd.f32 %v1907_v57, %v1906_v53 }
 0x16d   : > { %v1910_v18 = vadd.f32 %v1909_v54, %v1908_v59 }
 0x16f   : > { %v1912_v6 = vadd.f32 %v1911_v5, %v1910_v18 }
 0x171   : > { %v1913_v14 = vrot.slane %v1912_v6, 4 }
 0x173   : > { %v1914_v60 = vadd.f32 %v1913_v14, %v1912_v6 }
 0x175   : > { %v1915_v62 = vrot.slane %v1914_v60, 2 }
 0x177   : > { %v1916_v0 = vadd.f32 %v1915_v62, %v1914_v60 }
 0x179   : > { %v1917_v28 = vrot.slane %v1916_v0, 1 }
 0x17b   : > { %v1918_v7 = vadd.f32 %v1917_v28, %v1916_v0 }
 0x17d   : > { %v1920_v58 = vmul.f32 0.015625, %v1918_v7 }
 0x17f   : > { %1922 = vst.msk [vmem:[%s286_s29] sm:$0x1] %vm1921_vm8, %v1920_v58 }
 0x180 PF: > { %s15_s21 = sadd.s32 1, %s2614_s21   ;;  %s3226_s15 = smov %s2602_s18 }
 0x181   : > { %p12_p12 = scmp.ge.s32.totalorder %s15_s21, 50   ;;  %s3227_s16 = smov %s2606_s19 }
 0x182   : > { %s3228_s17 = smov %s2610_s20  ;;  %s3229_s18 = smov %s3233_s22 }
 0x183   : > { %s3230_s19 = smov %s3237_s23  ;;  %s3231_s20 = smov %s3241_s24 }
 0x184   :  { %14 = sbr.rel (!%p12_p12) target bundleno = 4 (0x4), region = 95 }

// kernel: dase_basic_block.3
= control target key start
LH: loop header
LB: loop body
LE: loop exit
PB: predicated region body
PF: predicated region fallthrough
CT: control target
= control target key end

     0   :  { %s2581_s12 = smov 0   ;;  %s2583_s13 = smov 0   ;;  %s3135_s0 = inlined_call_operand.vmem [shape: bf16[2,10,10,10,16], index: 0, kind: input, shape index: {}]   ;;  %s3136_s1 = inlined_call_operand.vmem [shape: bf16[3,9,16,16], index: 1, kind: input, shape index: {}]   ;;  %s3137_s2 = inlined_call_operand.vmem [shape: f32[1,16], index: 2, kind: input, shape index: {}]   ;;  %s3138_s3 = inlined_call_operand.vmem [shape: bf16[2,8,64,16], index: 3, kind: output, shape index: {}]  }
   0x1   :  { %s2585_s14 = smov 0   ;;  %s2587_s15 = smov 0  }
   0x2   :  { %s2589_s16 = smov 0   ;;  %s2591_s17 = smov 0  }
   0x3   :  { %s2593_s18 = smov 0  }
   0x4 LB: > { %s25_s19 = sadd.s32 1, %s2546_s15  ;;  %s28_s20 = sadd.s32 1, %s2550_s16  ;;  %s2558_s18 = sphi %s2593_s18, %s13_s18   ;;  %s2554_s17 = sphi %s2591_s17, %s3148_s17   ;;  %s2550_s16 = sphi %s2589_s16, %s3147_s16   ;;  %s2546_s15 = sphi %s2587_s15, %s3146_s15   ;;  %s2542_s14 = sphi %s2585_s14, %s3145_s14   ;;  %s2538_s13 = sphi %s2583_s13, %s3144_s13   ;;  %s2534_s12 = sphi %s2581_s12, %s3143_s12  }
   0x5   : > { %p26_p0 = scmp.ge.s32.totalorder %s25_s19, 3  ;;  %p2010_p1 = scmp.ge.s32.totalorder %s2558_s18, 1 }
   0x6   : > { %p178_p2 = scmp.lt.s32.totalorder %s2558_s18, 49  ;;  %s32_s21 = sadd.s32 1, %s2554_s17 }
   0x7   : > { %s3150_s19 = smov (%p26_p0, %s25_s19), 0  ;;  %s3152_s20 = smov (!%p26_p0, %s28_s20), %s2550_s16 }
   0x8   : > { %p179_p3 = pnand %p2010_p1, %p178_p2  ;;  %p30_p4 = scmp.ge.s32.totalorder %s3152_s20, 8 }
   0x9   : > { %s216_s22 = sadd.s32 (!%p179_p3), %s2534_s12, %s2538_s13  ;;  %p217_p6 = scmp.lt.s32.totalorder (!%p179_p3), %s2542_s14, 1 }
   0xa   : > { %s3154_s20 = smov (%p30_p4, %s3152_s20), 0  ;;  %s3156_s21 = smov (!%p30_p4, %s32_s21), %s2554_s17 }
   0xb   : > { %p34_p5 = scmp.ge.s32.totalorder %s3156_s21, 2  ;;  %182 = sbr.rel (%p179_p3) target bundleno = 366 (0x16e), region = 32 }
   0xc   : > { %p219_p7 = scmp.lt.s32.totalorder (!%p179_p3), %s216_s22, 9  ;;  %p227_p8 = scmp.lt.s32.totalorder (!%p179_p3), %s2534_s12, 2 }
   0xd   : > { %s3158_s21 = smov (%p34_p5, %s3156_s21), 0  ;;  %p234_p9 = scmp.lt.s32.totalorder (!%p179_p3), %s2538_s13, 7 }
   0xe   : > { %p2016_p10 = scmp.ne.s32.totalorder (!%p179_p3), %s2534_s12, 0 }
  0x12   : > { %s3160_s14 = smov (!%p217_p6, %s2542_s14), 1  ;;  %s3162_s22 = smov (!%p219_p7, %s216_s22), 9 }
  0x13   : > { %s2424_s23 = smul.u32 200, %s3160_s14  ;;  %s2014_s8 = sshll.u32 %s3160_s14, 6  ;;  %vm246_vm0 = vcmask (!%p2016_p10), 130048   ;;  %v2560_v0 = vmov (!%p2016_p10), 0.0  }
  0x14   : > { %s2423_s24 = smul.u32 20, %s3162_s22  ;;  %s3164_s13 = smov (!%p234_p9, %s2538_s13), 7  ;;  %247 = vst.msk [vmem:[#allocation2] sm:$0xff] (!%p2016_p10), %vm246_vm0, %v2560_v0  ;;  %248 = vst.msk [vmem:[#allocation2 + $0x8] sm:$0xff] (!%p2016_p10), %vm246_vm0, %v2560_v0 }
  0x15   : > { %s228_s25 = scalar_select %p227_p8, %s2534_s12, 2 }
  0x16   : > { %s223_s26 = sadd.s32 %s2424_s23, %s2423_s24  ;;  %s2013_s9 = sshll.u32 %s3164_s13, 3  ;;  %249 = vst.msk [vmem:[#allocation2 + $0x10] sm:$0xff] (!%p2016_p10), %vm246_vm0, %v2560_v0  ;;  %250 = vst.msk [vmem:[#allocation2 + $0x18] sm:$0xff] (!%p2016_p10), %vm246_vm0, %v2560_v0 }
  0x17   : > { %s2011_s27 = sshll.u32 %s223_s26, 2  ;;  %s2425_s28 = smul.u32 72, %s228_s25  ;;  %251 = vst.msk [vmem:[#allocation2 + $0x20] sm:$0xff] (!%p2016_p10), %vm246_vm0, %v2560_v0  ;;  %252 = vst.msk [vmem:[#allocation2 + $0x28] sm:$0xff] (!%p2016_p10), %vm246_vm0, %v2560_v0 }
  0x18   : > { %s2635_s4 = scalar_lea.vmem %s3135_s0, %s2011_s27  ;;  %s238_s10 = sadd.s32 %s2014_s8, %s2013_s9  ;;  %253 = vst.msk [vmem:[#allocation2 + $0x30] sm:$0xff] (!%p2016_p10), %vm246_vm0, %v2560_v0  ;;  %254 = vst.msk [vmem:[#allocation2 + $0x38] sm:$0xff] (!%p2016_p10), %vm246_vm0, %v2560_v0 }
  0x19   : > { %s2640_s7 = scalar_lea.vmem %s3136_s1, %s2425_s28  ;;  %s2015_s11 = sshll.u32 %s238_s10, 2 }
  0x1a   : > { %s2646_s24 = scalar_lea.vmem %s3138_s3, %s2015_s11  ;;  %245 = sbr.rel (%p2016_p10) target bundleno = 33 (0x21), region = 36 }
  0x21 PF: > { %v2483_v1 = vld [vmem:[%s2640_s7 + $0x8] sm:$0xff]   ;;  %v2651_v2 = vld [vmem:[%s2640_s7 + $0x20] sm:$0xff]   ;;  %vm273_vm1 = vsmask.f32 3328  ;;  %vm274_vm2 = vsmask.f32 7440 }
  0x22   : > { %2267 = vmatprep.subr.bf16.mxu1 %v2483_v1  ;;  %v2654_v3 = vld [vmem:[%s2635_s4] sm:$0xf]  ;;  %v2657_v4 = vld [vmem:[%s2635_s4 + $0x8] sm:$0xf]  ;;  %v2660_v5 = vld [vmem:[%s2635_s4 + $0x4] sm:$0x1]  ;;  %2307 = vmatprep.subr.bf16.mxu0 %v2651_v2 }
  0x23   : > { %2268 = vmatpush3.bf16.msra.mxu1 %v2483_v1  ;;  %v2664_v6 = vld [vmem:[%s2635_s4 + $0xc] sm:$0x1]  ;;  %2308 = vmatpush3.bf16.msra.mxu0 %v2651_v2  ;;  %v277_v7 = vshrl.u32 %v2654_v3, 16  ;;  %v280_v8 = vshll.u32 %v2654_v3, 16  ;;  %v286_v9 = vshll.u32 %v2660_v5, 16  ;;  %v291_v10 = vshrl.u32 %v2657_v4, 16  ;;  %vm2691_vm4 = vmor %vm273_vm1, %vm274_vm2 }
  0x24   : > { %v294_v11 = vshll.u32 %v2657_v4, 16  ;;  %v300_v12 = vshll.u32 %v2664_v6, 16  ;;  %vm409_vm3 = vcmask 130048   ;;  %v2674_v17 = vld [vmem:[%s2640_s7] sm:$0xff]   ;;  %v2677_v18 = vld [vmem:[%s2640_s7 + $0x28] sm:$0xff]   ;;  %vm614_vm5 = vcmask 1042432  }
  0x25   : > { %v279_v13 = vrot.slane %v277_v7, 4  ;;  %v282_v14 = vrot.slane %v280_v8, 5  ;;  %v288_v15 = vrot.slane %v286_v9, 5  ;;  %v293_v16 = vrot.slane %v291_v10, 4  ;;  %v2075_v21 = vld [vmem:[%s2635_s4 + $0x8] sm:$0xf]  ;;  %2277 = vmatprep.subr.bf16.mxu1 %v2674_v17  ;;  %2317 = vmatprep.subr.bf16.mxu0 %v2677_v18 }
  0x26   : > { %v296_v19 = vrot.slane %v294_v11, 5  ;;  %v302_v20 = vrot.slane %v300_v12, 5  ;;  %v2681_v22 = vld [vmem:[%s2635_s4 + $0xc] sm:$0x1]  ;;  %v2077_v24 = vld [vmem:[%s2635_s4 + $0x10] sm:$0xf] }
  0x27   : > { %v283_v23 = vor.u32 %v282_v14, %v279_v13  ;;  %v2686_v25 = vld [vmem:[%s2635_s4 + $0x14] sm:$0x1]  ;;  %v895_v26 = vshrl.u32 %v2075_v21, 16  ;;  %v898_v27 = vshll.u32 %v2075_v21, 16  ;;  %v904_v30 = vshll.u32 %v2681_v22, 16  ;;  %p2202_p11 = scmp.ne.s32.totalorder %s2534_s12, 2 }
  0x28   : > { %v297_v29 = vor.u32 %v296_v19, %v293_v16  ;;  %v909_v31 = vshrl.u32 %v2077_v24, 16  ;;  %v912_v32 = vshll.u32 %v2077_v24, 16  ;;  %v918_v36 = vshll.u32 %v2686_v25, 16  ;;  %v2698_v41 = vld [vmem:[%s2635_s4 + $0x10] sm:$0xf] }
  0x29   : > { %v284_v33 = vrot.slane %v283_v23, 4  ;;  %v897_v34 = vrot.slane %v895_v26, 4  ;;  %v900_v35 = vrot.slane %v898_v27, 5  ;;  %v906_v38 = vrot.slane %v904_v30, 5  ;;  %v2704_v46 = vld [vmem:[%s2635_s4 + $0x18] sm:$0xf] }
  0x2a   : > { %v298_v37 = vrot.slane %v297_v29, 4  ;;  %v911_v39 = vrot.slane %v909_v31, 4  ;;  %v914_v40 = vrot.slane %v912_v32, 5  ;;  %v920_v44 = vrot.slane %v918_v36, 5  ;;  %v2707_v47 = vld [vmem:[%s2635_s4 + $0x14] sm:$0x1] }
  0x2b   : > { %v289_v42 = vsel %vm2691_vm4, %v284_v33, %v288_v15  ;;  %v901_v43 = vor.u32 %v900_v35, %v897_v34  ;;  %v1138_v45 = vrot.slane %v2681_v22, 5  ;;  %v1142_v50 = vrot.slane %v2686_v25, 5  ;;  %v2713_v51 = vld [vmem:[%s2635_s4 + $0x1c] sm:$0x1]  ;;  %v2079_v0 = vld [vmem:[%s2635_s4 + $0x18] sm:$0xf] }
  0x2c   : > { %v303_v48 = vsel %vm2691_vm4, %v298_v37, %v302_v20  ;;  %v915_v49 = vor.u32 %v914_v40, %v911_v39  ;;  %v305_v52 = vshrl.u32 %v2698_v41, 16  ;;  %v308_v55 = vshll.u32 %v2698_v41, 16  ;;  %v2726_v1 = vld [vmem:[%s2635_s4 + $0x1c] sm:$0x1]  ;;  %v2081_v10 = vld [vmem:[%s2635_s4 + $0x20] sm:$0xf] }
  0x2d   : > { %v2019_v53 = vcombine.low %v289_v42, %v303_v48  ;;  %v902_v54 = vrot.slane %v901_v43, 4  ;;  %v314_v56 = vshll.u32 %v2707_v47, 16  ;;  %v319_v59 = vshrl.u32 %v2704_v46, 16  ;;  %v2732_v11 = vld [vmem:[%s2635_s4 + $0x24] sm:$0x1] }
  0x2e   : > { %v916_v57 = vrot.slane %v915_v49, 4  ;;  %v307_v58 = vrot.slane %v305_v52, 4  ;;  %v322_v60 = vshll.u32 %v2704_v46, 16  ;;  %v310_v62 = vrot.slane %v308_v55, 5  ;;  %v2738_v29 = vld [vmem:[%s2635_s4 + $0x20] sm:$0xf] }
  0x2f   : > { %2269 = vmatprep.mubr.msk.bf16.mxu1 %vm409_vm3, %v2019_v53  ;;  %v907_v61 = vsel %vm2691_vm4, %v902_v54, %v906_v38  ;;  %v328_v63 = vshll.u32 %v2713_v51, 16  ;;  %v321_v8 = vrot.slane %v319_v59, 4  ;;  %v316_v14 = vrot.slane %v314_v56, 5  ;;  %v2741_v34 = vld [vmem:[%s2635_s4 + $0x28] sm:$0xf]  ;;  %v2756_v49 = vld [vmem:[%s2640_s7 + $0x10] sm:$0xff]  }
  0x30   : > { %v921_v7 = vsel %vm2691_vm4, %v916_v57, %v920_v44  ;;  %v324_v9 = vrot.slane %v322_v60, 5  ;;  %v311_v13 = vor.u32 %v310_v62, %v307_v58  ;;  %v923_v19 = vshrl.u32 %v2079_v0, 16  ;;  %v2746_v39 = vld [vmem:[%s2635_s4 + $0x24] sm:$0x1]  ;;  %v2753_v48 = vld [vmem:[%s2635_s4 + $0x2c] sm:$0x1] }
  0x31   : > { %v2093_v12 = vcombine.low %v907_v61, %v921_v7  ;;  %v330_v15 = vrot.slane %v328_v63, 5  ;;  %v926_v20 = vshll.u32 %v2079_v0, 16  ;;  %v932_v21 = vshll.u32 %v2726_v1, 16  ;;  %v2761_v56 = vld [vmem:[%s2635_s4 + $0x30] sm:$0xf] }
  0x32   : > { %v325_v16 = vor.u32 %v324_v9, %v321_v8  ;;  %v312_v23 = vrot.slane %v311_v13, 4  ;;  %v937_v24 = vshrl.u32 %v2081_v10, 16  ;;  %v940_v26 = vshll.u32 %v2081_v10, 16  ;;  %v2767_v61 = vld [vmem:[%s2635_s4 + $0x38] sm:$0xf] }
  0x33   : > { %2309 = vmatprep.mubr.msk.bf16.mxu0 %vm409_vm3, %v2093_v12  ;;  %v946_v27 = vshll.u32 %v2732_v11, 16  ;;  %v925_v31 = vrot.slane %v923_v19, 4  ;;  %v928_v32 = vrot.slane %v926_v20, 5  ;;  %v934_v33 = vrot.slane %v932_v21, 5  ;;  %v2772_v8 = vld [vmem:[%s2635_s4 + $0x34] sm:$0x1] }
  0x34   : > { %v326_v30 = vrot.slane %v325_v16, 4  ;;  %v317_v35 = vsel %vm2691_vm4, %v312_v23, %v316_v14  ;;  %v939_v36 = vrot.slane %v937_v24, 4  ;;  %v942_v37 = vrot.slane %v940_v26, 5  ;;  %v2778_v14 = vld [vmem:[%s2635_s4 + $0x3c] sm:$0x1] }
  0x35   : > { %v948_v38 = vrot.slane %v946_v27, 5  ;;  %v929_v42 = vor.u32 %v928_v32, %v925_v31  ;;  %v1146_v43 = vrot.slane %v2726_v1, 5  ;;  %v1150_v44 = vrot.slane %v2732_v11, 5  ;;  %v2102_v27 = vld [vmem:[%s2635_s4 + $0x8] sm:$0xe] }
  0x36   : > { %v331_v40 = vsel %vm2691_vm4, %v326_v30, %v330_v15  ;;  %v943_v53 = vor.u32 %v942_v37, %v939_v36  ;;  %v333_v54 = vshrl.u32 %v2738_v29, 16  ;;  %v336_v55 = vshll.u32 %v2738_v29, 16  ;;  %v2781_v15 = vld [vmem:[%s2640_s7 + $0x30] sm:$0xff]   ;;  %v2104_v36 = vld [vmem:[%s2635_s4 + $0x18] sm:$0xe] }
  0x37   : > { %v2020_v52 = vcombine.low %v317_v35, %v331_v40  ;;  %v930_v57 = vrot.slane %v929_v42, 4  ;;  %v342_v58 = vshll.u32 %v2746_v39, 16  ;;  %v347_v59 = vshrl.u32 %v2741_v34, 16  ;;  %v2103_v30 = vld [vmem:[%s2635_s4 + $0x10] sm:$0xe] }
  0x38   : > { %v350_v60 = vshll.u32 %v2741_v34, 16  ;;  %v944_v62 = vrot.slane %v943_v53, 4  ;;  %v335_v63 = vrot.slane %v333_v54, 4  ;;  %v338_v0 = vrot.slane %v336_v55, 5 }
  0x39   : > { %2270 = vmatmul.mubr.msk.bf16.vlgmr.msra.gmra.mrb[0].mxu1 %vm409_vm3, %v2020_v52  ;;  %v356_v7 = vshll.u32 %v2753_v48, 16  ;;  %v935_v9 = vsel %vm2691_vm4, %v930_v57, %v934_v33  ;;  %v344_v10 = vrot.slane %v342_v58, 5  ;;  %v349_v12 = vrot.slane %v347_v59, 4  ;;  %v2105_v52 = vld [vmem:[%s2635_s4 + $0x20] sm:$0xe] }
  0x3a   : > { %2278 = vmatpush3.bf16.msra.mxu1 %v2674_v17  ;;  %v352_v13 = vrot.slane %v350_v60, 5  ;;  %v949_v16 = vsel %vm2691_vm4, %v944_v62, %v948_v38  ;;  %v339_v19 = vor.u32 %v338_v0, %v335_v63  ;;  %v361_v17 = vshrl.u32 %v2761_v56, 16  ;;  %v2801_v57 = vld [vmem:[%s2635_s4 + $0x2c] sm:$0x1]  ;;  %v2812_v63 = vld [vmem:[%s2635_s4 + $0x34] sm:$0x1] }
  0x3b   : > { %v358_v20 = vrot.slane %v356_v7, 5  ;;  %2287 = vmatprep.subr.bf16.mxu1 %v2756_v49  ;;  %v2094_v21 = vcombine.low %v935_v9, %v949_v16  ;;  %v364_v24 = vshll.u32 %v2761_v56, 16  ;;  %v370_v26 = vshll.u32 %v2772_v8, 16  ;;  %v2106_v0 = vld [vmem:[%s2635_s4 + $0x28] sm:$0xe] }
  0x3c   : > { %v353_v23 = vor.u32 %v352_v13, %v349_v12  ;;  %v340_v31 = vrot.slane %v339_v19, 4  ;;  %v363_v32 = vrot.slane %v361_v17, 4  ;;  %v375_v33 = vshrl.u32 %v2767_v61, 16  ;;  %v2107_v13 = vld [vmem:[%s2635_s4 + $0x30] sm:$0xe] }
  0x3d   : > { %v378_v35 = vshll.u32 %v2767_v61, 16  ;;  %2310 = vmatmul.mubr.msk.bf16.vlgmr.msra.gmra.mrb[0].mxu0 %vm409_vm3, %v2094_v21  ;;  %v366_v38 = vrot.slane %v364_v24, 5  ;;  %v372_v40 = vrot.slane %v370_v26, 5  ;;  %v384_v42 = vshll.u32 %v2778_v14, 16  ;;  %v2821_v17 = vld [vmem:[%s2635_s4 + $0x3c] sm:$0x1] }
  0x3e   : > { %v354_v37 = vrot.slane %v353_v23, 4  ;;  %2318 = vmatpush3.bf16.msra.mxu0 %v2677_v18  ;;  %v345_v53 = vsel %vm2691_vm4, %v340_v31, %v344_v10  ;;  %v377_v54 = vrot.slane %v375_v33, 4  ;;  %vm615_vm6 = vcmask 1046532   ;;  %v2108_v21 = vld [vmem:[%s2635_s4 + $0x38] sm:$0xe] }
  0x3f   : > { %v380_v55 = vrot.slane %v378_v35, 5  ;;  %v367_v59 = vor.u32 %v366_v38, %v363_v32  ;;  %v386_v60 = vrot.slane %v384_v42, 5  ;;  %vm2806_vm7 = vmor %vm614_vm5, %vm615_vm6  ;;  %v2110_v62 = vrot.slane %v2102_v27, 9  ;;  %2327 = vmatprep.subr.bf16.mxu0 %v2781_v15  ;;  %v2109_v23 = vld [vmem:[%s2635_s4 + $0x40] sm:$0xe] }
  0x40   : > { %v359_v58 = vsel %vm2691_vm4, %v354_v37, %v358_v20  ;;  %v2111_v10 = vrot.slane %v2103_v30, 9  ;;  %v2112_v12 = vrot.slane %v2104_v36, 9  ;;  %v2113_v20 = vrot.slane %v2105_v52, 9  ;;  %v2847_v33 = vld [vmem:[%s2635_s4 + $0x44] sm:$0x1] }
  0x41   : > { %v2021_v7 = vcombine.low %v345_v53, %v359_v58  ;;  %v381_v9 = vor.u32 %v380_v55, %v377_v54  ;;  %v368_v16 = vrot.slane %v367_v59, 4  ;;  %v1139_v19 = vsel %vm2806_vm7, %v2110_v62, %v1138_v45  ;;  %v590_v36 = vld [vmem:[%s2635_s4] sm:$0xe]  ;;  %v591_v37 = vld [vmem:[%s2635_s4 + $0x8] sm:$0xe]  ;;  %v2862_v55 = vld [vmem:[%s2640_s7 + $0x38] sm:$0xff]  }
  0x42   : > { %v1143_v26 = vsel %vm2806_vm7, %v2111_v10, %v1142_v50  ;;  %v1147_v22 = vsel %vm2806_vm7, %v2112_v12, %v1146_v43  ;;  %v2114_v45 = vrot.slane %v2106_v0, 9  ;;  %v1151_v25 = vsel %vm2806_vm7, %v2113_v20, %v1150_v44  ;;  %v592_v58 = vld [vmem:[%s2635_s4 + $0x10] sm:$0xe]  ;;  %v593_v59 = vld [vmem:[%s2635_s4 + $0x18] sm:$0xe] }
  0x43   : > { %2273 = vmatprep.mubr.msk.bf16.mxu1 %vm409_vm3, %v2021_v7  ;;  %v382_v24 = vrot.slane %v381_v9, 4  ;;  %v373_v27 = vsel %vm2691_vm4, %v368_v16, %v372_v40  ;;  %v2120_v30 = vcombine.low %v1139_v19, %v1143_v26  ;;  %v1154_v31 = vrot.slane %v2801_v57, 5  ;;  %v2880_v10 = vld [vmem:[%s2640_s7 + $0x18] sm:$0xff]   ;;  %v594_v16 = vld [vmem:[%s2635_s4 + $0x20] sm:$0xe] }
  0x44   : > { %v2028_v1 = vcombine.low %v2654_v3, %v2657_v4  ;;  %v2115_v43 = vrot.slane %v2107_v13, 9  ;;  %v1158_v32 = vrot.slane %v2812_v63, 5  ;;  %v2121_v11 = vcombine.low %v1147_v22, %v1151_v25  ;;  %v2897_v22 = vld [vmem:[%s2635_s4 + $0x38] sm:$0xe] }
  0x45   : > { %v387_v50 = vsel %vm2691_vm4, %v382_v24, %v386_v60  ;;  %2319 = vmatprep.mubr.msk.bf16.mxu0 %vm409_vm3, %v2120_v30  ;;  %v1155_v44 = vsel %vm2806_vm7, %v2114_v45, %v1154_v31  ;;  %v2116_v4 = vrot.slane %v2108_v21, 9  ;;  %v1162_v38 = vrot.slane %v2821_v17, 5  ;;  %v2148_v45 = vld [vmem:[%s2635_s4 + $0x10] sm:$0xf]  ;;  %v2150_v30 = vld [vmem:[%s2635_s4 + $0x18] sm:$0xf] }
  0x46   : > { %v2022_v35 = vcombine.low %v373_v27, %v387_v50  ;;  %v1159_v3 = vsel %vm2806_vm7, %v2115_v43, %v1158_v32  ;;  %v2117_v40 = vrot.slane %v2109_v23, 9  ;;  %v619_v42 = vrot.slane %v2660_v5, 5  ;;  %v2905_v27 = vld [vmem:[%s2635_s4 + $0x14] sm:$0x1]  ;;  %v2918_v31 = vld [vmem:[%s2635_s4 + $0x1c] sm:$0x1] }
  0x47   : > { %v623_v52 = vrot.slane %v2664_v6, 5  ;;  %v2122_v53 = vcombine.low %v1155_v44, %v1159_v3  ;;  %v1166_v54 = vrot.slane %v2847_v33, 5  ;;  %v1163_v5 = vsel %vm2806_vm7, %v2116_v4, %v1162_v38  ;;  %v2152_v32 = vld [vmem:[%s2635_s4 + $0x20] sm:$0xf]  ;;  %v2154_v38 = vld [vmem:[%s2635_s4 + $0x28] sm:$0xf] }
  0x48   : > { %2274 = vmatmul.mubr.msk.bf16.gmra.mrb[4].mxu1 %vm409_vm3, %v2022_v35  ;;  %v2037_v60 = vrot.slane %v590_v36, 9  ;;  %v2038_v62 = vrot.slane %v591_v37, 9  ;;  %v627_v0 = vrot.slane %v2707_v47, 5  ;;  %v631_v7 = vrot.slane %v2713_v51, 5  ;;  %v595_v47 = vld [vmem:[%s2635_s4 + $0x28] sm:$0xe] }
  0x49   : > { %2279 = vmatprep.mubr.msk.bf16.mxu1 %vm409_vm3, %v2028_v1  ;;  %2320 = vmatmul.mubr.msk.bf16.vlgmr.msra.gmra.mrb[0].mxu0 %vm409_vm3, %v2121_v11  ;;  %v1167_v6 = vsel %vm2806_vm7, %v2117_v40, %v1166_v54  ;;  %v2029_v9 = vcombine.low %v2698_v41, %v2704_v46  ;;  %v2039_v12 = vrot.slane %v592_v58, 9  ;;  %v2040_v13 = vrot.slane %v593_v59, 9  ;;  %v2889_v46 = vld [vmem:[%s2635_s4 + $0x30] sm:$0xe]  ;;  %v2932_v36 = vld [vmem:[%s2635_s4 + $0x24] sm:$0x1] }
  0x4a   : > { %2328 = vmatpush3.bf16.msra.mxu0 %v2781_v15  ;;  %2323 = vmatprep.mubr.msk.bf16.mxu0 %vm409_vm3, %v2122_v53  ;;  %v2123_v19 = vcombine.low %v1163_v5, %v1167_v6  ;;  %v2030_v51 = vcombine.low %v2738_v29, %v2741_v34  ;;  %v2493_v15 = vld [vmem:[%s2635_s4 + $0x10] ss:$8 sps:$4 sm:$0xff]   ;;  %v2041_v20 = vrot.slane %v594_v16, 9  ;;  %v635_v41 = vrot.slane %v2746_v39, 5  ;;  %v2944_v58 = vld [vmem:[%s2635_s4 + $0x2c] sm:$0x1] }
  0x4b   : > { %2337 = vmatprep.subr.bf16.mxu0 %v2862_v55  ;;  %v620_v21 = vsel %vm2806_vm7, %v2037_v60, %v619_v42  ;;  %v624_v23 = vsel %vm2806_vm7, %v2038_v62, %v623_v52  ;;  %v2042_v24 = vrot.slane %v595_v47, 9  ;;  %v639_v26 = vrot.slane %v2753_v48, 5  ;;  %v2495_v42 = vld [vmem:[%s2635_s4 + $0x20] ss:$8 sps:$4 sm:$0xff]  }
  0x4c   : > { %v2031_v29 = vcombine.low %v2761_v56, %v2767_v61  ;;  %v2043_v34 = vrot.slane %v2889_v46, 9  ;;  %v643_v39 = vrot.slane %v2772_v8, 5  ;;  %v2911_v25 = vsel %vm2806_vm7, %v2039_v12, %v627_v0  ;;  %v2497_v12 = vld [vmem:[%s2635_s4 + $0x30] ss:$8 sps:$4 sm:$0xff]  }
  0x4d   : > { %v2915_v48 = vsel %vm2806_vm7, %v2040_v13, %v631_v7  ;;  %v1414_v56 = vshrl.u32 %v2148_v45, 16  ;;  %v1417_v61 = vshll.u32 %v2148_v45, 16  ;;  %v2047_v8 = vcombine.low %v620_v21, %v624_v23 }
  0x4e   : > { %v2924_v50 = vsel %vm2806_vm7, %v2041_v20, %v635_v41  ;;  %v1423_v1 = vshll.u32 %v2905_v27, 16  ;;  %v1428_v43 = vshrl.u32 %v2150_v30, 16  ;;  %v1431_v44 = vshll.u32 %v2150_v30, 16  ;;  %v2158_v30 = vld [vmem:[%s2635_s4 + $0x38] sm:$0xf] }
  0x4f   : > { %v1416_v35 = vrot.slane %v1414_v56, 4  ;;  %v1419_v11 = vrot.slane %v1417_v61, 5  ;;  %v647_v37 = vrot.slane %v2778_v14, 5  ;;  %v1437_v4 = vshll.u32 %v2918_v31, 16 }
  0x50   : > { %2280 = vmatmul.mubr.msk.bf16.vlgmr.msra.gmra.mrb[0].mxu1 %vm409_vm3, %v2029_v9  ;;  %v1430_v3 = vrot.slane %v1428_v43, 4  ;;  %v1442_v40 = vshrl.u32 %v2152_v32, 16  ;;  %v2941_v52 = vsel %vm2806_vm7, %v2042_v24, %v639_v26  ;;  %v1433_v54 = vrot.slane %v1431_v44, 5  ;;  %v2156_v24 = vld [vmem:[%s2635_s4 + $0x30] sm:$0xf] }
  0x51   : > { %2288 = vmatpush3.bf16.msra.mxu1 %v2756_v49  ;;  %2283 = vmatprep.mubr.msk.bf16.mxu1 %vm409_vm3, %v2030_v51  ;;  %v2044_v49 = vrot.slane %v2897_v22, 9  ;;  %v1420_v53 = vor.u32 %v1419_v11, %v1416_v35  ;;  %v1445_v59 = vshll.u32 %v2152_v32, 16  ;;  %v1425_v5 = vrot.slane %v1423_v1, 5  ;;  %v2160_v32 = vld [vmem:[%s2635_s4 + $0x40] sm:$0xf] }
  0x52   : > { %2324 = vmatmul.mubr.msk.bf16.gmra.mrb[4].mxu0 %vm409_vm3, %v2123_v19  ;;  %2297 = vmatprep.subr.bf16.mxu1 %v2880_v10  ;;  %v1444_v6 = vrot.slane %v1442_v40, 4  ;;  %v1456_v14 = vshrl.u32 %v2154_v38, 16  ;;  %v1459_v60 = vshll.u32 %v2154_v38, 16  ;;  %v1434_v0 = vor.u32 %v1433_v54, %v1430_v3 }
  0x53   : > { %2329 = vmatprep.mubr.msk.bf16.mxu0 %vm409_vm3, %v2493_v15  ;;  %v1421_v62 = vrot.slane %v1420_v53, 4  ;;  %v1447_v7 = vrot.slane %v1445_v59, 5  ;;  %v1451_v9 = vshll.u32 %v2932_v36, 16  ;;  %v1439_v13 = vrot.slane %v1437_v4, 5  ;;  %v2951_v15 = vld [vmem:[%s2640_s7 + $0x40] sm:$0xff]  }
  0x54   : > { %v1458_v16 = vrot.slane %v1456_v14, 4  ;;  %v1461_v47 = vrot.slane %v1459_v60, 5  ;;  %v1465_v19 = vshll.u32 %v2944_v58, 16  ;;  %v1435_v51 = vrot.slane %v1434_v0, 4 }
  0x55   : > { %v1448_v20 = vor.u32 %v1447_v7, %v1444_v6  ;;  %v2048_v41 = vcombine.low %v2911_v25, %v2915_v48  ;;  %v2049_v46 = vcombine.low %v2924_v50, %v2941_v52  ;;  %v2960_v21 = vsel %vm2806_vm7, %v2043_v34, %v643_v39  ;;  %v2981_v48 = vld [vmem:[%s2635_s4 + $0x3c] sm:$0x1]  ;;  %v2995_v52 = vld [vmem:[%s2635_s4 + $0x4c] sm:$0x1] }
  0x56   : > { %v1462_v23 = vor.u32 %v1461_v47, %v1458_v16  ;;  %v2966_v26 = vsel %vm2806_vm7, %v2044_v49, %v647_v37  ;;  %v1426_v22 = vsel %vm2691_vm4, %v1421_v62, %v1425_v5  ;;  %v2970_v45 = vrot.slane %v1451_v9, 5  ;;  %v2989_v37 = vld [vmem:[%s2635_s4 + $0x44] sm:$0x1] }
  0x57   : > { %v1470_v34 = vshrl.u32 %v2156_v24, 16  ;;  %v1440_v39 = vsel %vm2691_vm4, %v1435_v51, %v1439_v13  ;;  %v1467_v25 = vrot.slane %v1465_v19, 5  ;;  %v1473_v56 = vshll.u32 %v2156_v24, 16  ;;  %v2175_v24 = vld [vmem:[%s2635_s4 + $0x10] sm:$0xe] }
  0x58   : > { %2284 = vmatmul.mubr.msk.bf16.gmra.mrb[4].mxu1 %vm409_vm3, %v2031_v29  ;;  %v2973_v29 = vld [vmem:[%s2635_s4 + $0x34] sm:$0x1]  ;;  %v1449_v50 = vrot.slane %v1448_v20, 4  ;;  %v1487_v43 = vshll.u32 %v2158_v30, 16  ;;  %v1463_v49 = vrot.slane %v1462_v23, 4  ;;  %v1493_v44 = vshll.u32 %v2981_v48, 16 }
  0x59   : > { %2289 = vmatprep.mubr.msk.bf16.mxu1 %vm409_vm3, %v2047_v8  ;;  %v1479_v61 = vshll.u32 %v2973_v29, 16  ;;  %v2498_v8 = vld [vmem:[%s2635_s4 + $0x40] ss:$8 sps:$4 sm:$0xff]   ;;  %v1472_v1 = vrot.slane %v1470_v34, 4  ;;  %v1475_v35 = vrot.slane %v1473_v56, 5  ;;  %v2050_v3 = vcombine.low %v2960_v21, %v2966_v26 }
  0x5a   : > { %2330 = vmatmul.mubr.msk.bf16.vlgmr.msra.gmra.mrb[0].mxu0 %vm409_vm3, %v2495_v42  ;;  %v2166_v4 = vcombine.low %v1426_v22, %v1440_v39  ;;  %v1489_v40 = vrot.slane %v1487_v43, 5  ;;  %v2162_v42 = vld [vmem:[%s2635_s4 + $0x48] sm:$0xf]  ;;  %v1495_v54 = vrot.slane %v1493_v44, 5  ;;  %v1498_v59 = vshrl.u32 %v2160_v32, 16 }
  0x5b   : > { %2338 = vmatpush3.bf16.msra.mxu0 %v2862_v55  ;;  %2333 = vmatprep.mubr.msk.bf16.mxu0 %vm409_vm3, %v2497_v12  ;;  %v1484_v55 = vshrl.u32 %v2158_v30, 16  ;;  %v1481_v11 = vrot.slane %v1479_v61, 5  ;;  %v1476_v53 = vor.u32 %v1475_v35, %v1472_v1  ;;  %v1501_v5 = vshll.u32 %v2160_v32, 16  ;;  %v2176_v26 = vld [vmem:[%s2635_s4 + $0x18] sm:$0xe] }
  0x5c   : > { %2347 = vmatprep.subr.bf16.mxu0 %v2951_v15  ;;  %v1507_v14 = vshll.u32 %v2989_v37, 16  ;;  %v1512_v60 = vshrl.u32 %v2162_v42, 16  ;;  %v1515_v62 = vshll.u32 %v2162_v42, 16  ;;  %v1500_v7 = vrot.slane %v1498_v59, 4  ;;  %v2500_v22 = vld [vmem:[%s2635_s4 + $0x8] ss:$8 sps:$4 sm:$0xff]  }
  0x5d   : > { %v1486_v38 = vrot.slane %v1484_v55, 4  ;;  %v1477_v0 = vrot.slane %v1476_v53, 4  ;;  %v1503_v9 = vrot.slane %v1501_v5, 5  ;;  %v1521_v12 = vshll.u32 %v2995_v52, 16  ;;  %v2083_v56 = vld [vmem:[%s2635_s4 + $0x28] sm:$0xf] }
  0x5e   : > { %v1514_v16 = vrot.slane %v1512_v60, 4  ;;  %v1517_v47 = vrot.slane %v1515_v62, 5  ;;  %v1657_v19 = vrot.slane %v2905_v27, 5  ;;  %v1468_v51 = vsel %vm2691_vm4, %v1463_v49, %v1467_v25  ;;  %v2177_v43 = vld [vmem:[%s2635_s4 + $0x20] sm:$0xe] }
  0x5f   : > { %v1490_v6 = vor.u32 %v1489_v40, %v1486_v38  ;;  %v1504_v20 = vor.u32 %v1503_v9, %v1500_v7  ;;  %v1509_v21 = vrot.slane %v1507_v14, 5  ;;  %v1523_v30 = vrot.slane %v1521_v12, 5  ;;  %v2178_v32 = vld [vmem:[%s2635_s4 + $0x28] sm:$0xe]  ;;  %v2179_v38 = vld [vmem:[%s2635_s4 + $0x30] sm:$0xe] }
  0x60   : > { %2290 = vmatmul.mubr.msk.bf16.vlgmr.msra.gmra.mrb[0].mxu1 %vm409_vm3, %v2048_v41  ;;  %v1661_v41 = vrot.slane %v2918_v31, 5  ;;  %v1518_v23 = vor.u32 %v1517_v47, %v1514_v16  ;;  %v2183_v34 = vrot.slane %v2175_v24, 9  ;;  %v2184_v39 = vrot.slane %v2176_v26, 9  ;;  %v2501_v40 = vld [vmem:[%s2635_s4 + $0x18] ss:$8 sps:$4 sm:$0xff]  }
  0x61   : > { %2298 = vmatpush3.bf16.msra.mxu1 %v2880_v10  ;;  %2293 = vmatprep.mubr.msk.bf16.mxu1 %vm409_vm3, %v2049_v46  ;;  %v1491_v13 = vrot.slane %v1490_v6, 4  ;;  %v1454_v10 = vsel %vm2691_vm4, %v1449_v50, %v2970_v45  ;;  %v1482_v46 = vsel %vm2691_vm4, %v1477_v0, %v1481_v11  ;;  %v1505_v45 = vrot.slane %v1504_v20, 4  ;;  %v2089_v60 = vld [vmem:[%s2635_s4 + $0x40] sm:$0xf]  ;;  %v2180_v9 = vld [vmem:[%s2635_s4 + $0x38] sm:$0xe] }
  0x62   : > { %2334 = vmatmul.mubr.msk.bf16.gmra.mrb[4].mxu0 %vm409_vm3, %v2498_v8  ;;  %2357 = vmatprep.subr.bf16.mxu1 %v2651_v2  ;;  %v2167_v25 = vcombine.low %v1454_v10, %v1468_v51  ;;  %v1519_v31 = vrot.slane %v1518_v23, 4  ;;  %v2085_v8 = vld [vmem:[%s2635_s4 + $0x30] sm:$0xf]  ;;  %v951_v50 = vshrl.u32 %v2083_v56, 16  ;;  %v1658_v1 = vsel %vm2806_vm7, %v2183_v34, %v1657_v19 }
  0x63   : > { %2339 = vmatprep.mubr.msk.bf16.mxu0 %vm409_vm3, %v2166_v4  ;;  %v1496_v27 = vsel %vm2691_vm4, %v1491_v13, %v1495_v54  ;;  %v1662_v55 = vsel %vm2806_vm7, %v2184_v39, %v1661_v41  ;;  %v1665_v49 = vrot.slane %v2932_v36, 5  ;;  %v960_v35 = vshll.u32 %v2801_v57, 16  ;;  %v2087_v54 = vld [vmem:[%s2635_s4 + $0x38] sm:$0xf]  ;;  %v2502_v12 = vld [vmem:[%s2635_s4 + $0x28] ss:$8 sps:$4 sm:$0xff]  }
  0x64   : > { %v2168_v61 = vcombine.low %v1482_v46, %v1496_v27  ;;  %v1510_v11 = vsel %vm2691_vm4, %v1505_v45, %v1509_v21  ;;  %v1524_v44 = vsel %vm2691_vm4, %v1519_v31, %v1523_v30  ;;  %v954_v4 = vshll.u32 %v2083_v56, 16  ;;  %v2503_v39 = vld [vmem:[%s2635_s4 + $0x38] ss:$8 sps:$4 sm:$0xff]   ;;  %v2182_v31 = vld [vmem:[%s2635_s4 + $0x48] sm:$0xe] }
  0x65   : > { %v1669_v42 = vrot.slane %v2944_v58, 5  ;;  %v965_v36 = vshrl.u32 %v2085_v8, 16  ;;  %v968_v57 = vshll.u32 %v2085_v8, 16  ;;  %v974_v53 = vshll.u32 %v2812_v63, 16 }
  0x66   : > { %v2193_v59 = vcombine.low %v1658_v1, %v1662_v55  ;;  %v2185_v5 = vrot.slane %v2177_v43, 9  ;;  %v2186_v6 = vrot.slane %v2178_v32, 9  ;;  %v956_v14 = vrot.slane %v954_v4, 5 }
  0x67   : > { %v2169_v62 = vcombine.low %v1510_v11, %v1524_v44  ;;  %v962_v0 = vrot.slane %v960_v35, 5  ;;  %v967_v7 = vrot.slane %v965_v36, 4  ;;  %v970_v58 = vrot.slane %v968_v57, 5 }
  0x68   : > { %2294 = vmatmul.mubr.msk.bf16.gmra.mrb[4].mxu1 %vm409_vm3, %v2050_v3  ;;  %v953_v3 = vrot.slane %v951_v50, 4  ;;  %v2187_v16 = vrot.slane %v2179_v38, 9  ;;  %v979_v47 = vshrl.u32 %v2087_v54, 16  ;;  %v982_v63 = vshll.u32 %v2087_v54, 16 }
  0x69   : > { %2299 = vmatprep.mubr.msk.bf16.mxu1 %vm409_vm3, %v2500_v22  ;;  %v971_v19 = vor.u32 %v970_v58, %v967_v7  ;;  %v976_v10 = vrot.slane %v974_v53, 5  ;;  %v996_v51 = vshll.u32 %v2089_v60, 16  ;;  %v1673_v41 = vrot.slane %v2973_v29, 5 }
  0x6a   : > { %2340 = vmatmul.mubr.msk.bf16.vlgmr.msra.gmra.mrb[0].mxu0 %vm409_vm3, %v2167_v25  ;;  %v957_v13 = vor.u32 %v956_v14, %v953_v3  ;;  %v2188_v46 = vrot.slane %v2180_v9, 9  ;;  %v1677_v27 = vrot.slane %v2981_v48, 5  ;;  %v981_v23 = vrot.slane %v979_v47, 4  ;;  %v2181_v25 = vld [vmem:[%s2635_s4 + $0x40] sm:$0xe]  ;;  %v1794_v9 = vld [vmem:[#allocation2 + $0x8] sm:$0xff] }
  0x6b   : > { %2348 = vmatpush3.bf16.msra.mxu0 %v2951_v15  ;;  %2343 = vmatprep.mubr.msk.bf16.mxu0 %vm409_vm3, %v2168_v61  ;;  %v993_v15 = vshrl.u32 %v2089_v60, 16  ;;  %v972_v21 = vrot.slane %v971_v19, 4  ;;  %v984_v24 = vrot.slane %v982_v63, 5  ;;  %v998_v22 = vrot.slane %v996_v51, 5  ;;  %v1793_v14 = vld [vmem:[#allocation2] sm:$0xff] }
  0x6c   : > { %v958_v20 = vrot.slane %v957_v13, 4  ;;  %v988_v45 = vshll.u32 %v2821_v17, 16  ;;  %v1670_v30 = vsel %vm2806_vm7, %v2186_v6, %v1669_v42  ;;  %v1674_v34 = vsel %vm2806_vm7, %v2187_v16, %v1673_v41 }
  0x6d   : > { %v995_v26 = vrot.slane %v993_v15, 4  ;;  %v977_v48 = vsel %vm2691_vm4, %v972_v21, %v976_v10  ;;  %v1678_v17 = vsel %vm2806_vm7, %v2188_v46, %v1677_v27  ;;  %v1002_v56 = vshll.u32 %v2847_v33, 16  ;;  %v1799_v15 = vld [vmem:[#allocation2 + $0x30] sm:$0xff]  ;;  %v1797_v46 = vld [vmem:[#allocation2 + $0x20] sm:$0xff] }
  0x6e   : > { %v963_v29 = vsel %vm2691_vm4, %v958_v20, %v962_v0  ;;  %v985_v8 = vor.u32 %v984_v24, %v981_v23  ;;  %v2195_v55 = vcombine.low %v1674_v34, %v1678_v17  ;;  %v2189_v43 = vrot.slane %v2181_v25, 9  ;;  %v1796_v0 = vld [vmem:[#allocation2 + $0x18] sm:$0xff] }
  0x6f   : > { %v2095_v61 = vcombine.low %v963_v29, %v977_v48  ;;  %v999_v50 = vor.u32 %v998_v22, %v995_v26  ;;  %v1681_v32 = vrot.slane %v2989_v37, 5  ;;  %v1685_v35 = vrot.slane %v2995_v52, 5  ;;  %v1800_v24 = vld [vmem:[#allocation2 + $0x38] sm:$0xff]  ;;  %v1798_v29 = vld [vmem:[#allocation2 + $0x28] sm:$0xff] }
  0x70   : > { %2300 = vmatmul.mubr.msk.bf16.vlgmr.msra.gmra.mrb[0].mxu1 %vm409_vm3, %v2501_v40  ;;  %v990_v11 = vrot.slane %v988_v45, 5  ;;  %v1004_v44 = vrot.slane %v1002_v56, 5  ;;  %v986_v3 = vrot.slane %v985_v8, 4  ;;  %vm1884_vm8 = vcmask (!%p2202_p11), 125952  }
  0x71   : > { %2358 = vmatpush3.bf16.msra.mxu1 %v2651_v2  ;;  %2303 = vmatprep.mubr.msk.bf16.mxu1 %vm409_vm3, %v2502_v12  ;;  %v1666_v2 = vsel %vm2806_vm7, %v2185_v5, %v1665_v49  ;;  %v2190_v49 = vrot.slane %v2182_v31, 9  ;;  %v1000_v4 = vrot.slane %v999_v50, 4  ;;  %v1682_v33 = vsel %vm2806_vm7, %v2189_v43, %v1681_v32  ;;  %v1795_v5 = vld [vmem:[#allocation2 + $0x10] sm:$0xff] }
  0x72   : > { %2344 = vmatmul.mubr.msk.bf16.gmra.mrb[4].mxu0 %vm409_vm3, %v2169_v62  ;;  %v2194_v1 = vcombine.low %v1666_v2, %v1670_v30  ;;  %v991_v52 = vsel %vm2691_vm4, %v986_v3, %v990_v11 }
  0x73   : > { %2349 = vmatprep.mubr.msk.bf16.mxu0 %vm409_vm3, %v2193_v59  ;;  %v1686_v37 = vsel %vm2806_vm7, %v2190_v49, %v1685_v35  ;;  %v1005_v38 = vsel %vm2691_vm4, %v1000_v4, %v1004_v44 }
  0x74   : > { %v2196_v40 = vcombine.low %v1682_v33, %v1686_v37  ;;  %v2096_v42 = vcombine.low %v991_v52, %v1005_v38 }
  0x78   : > { %2304 = vmatmul.mubr.msk.bf16.gmra.mrb[4].mxu1 %vm409_vm3, %v2503_v39  ;;  %v2203_v39 = vld [vmem:[%s3137_s2] ss:$0 sm:$0xff] (!%p2202_p11) }
  0x79   : > { %2313 = vmatprep.mubr.msk.bf16.mxu1 %vm409_vm3, %v2095_v61 }
  0x7a   : > { %2350 = vmatmul.mubr.msk.bf16.vlgmr.msra.gmra.mrb[0].mxu0 %vm409_vm3, %v2194_v1 }
  0x7b   : > { %2353 = vmatprep.mubr.msk.bf16.mxu0 %vm409_vm3, %v2195_v55 }
  0x82   : > { %2354 = vmatmul.mubr.msk.bf16.gmra.mrb[4].mxu0 %vm409_vm3, %v2196_v40 }
  0x84   : > { %2314 = vmatmul.mubr.msk.bf16.vlgmr.msra.gmra.mrb[4].mxu1 %vm409_vm3, %v2096_v42 }
 0x143   : > { %v2301_v36 = vpop.f32.mrb[0].mxu1 }
 0x144   : > { %v839_v57 = vpop.f32.mrb[1].mxu1 }
 0x145   : > { %v2302_v53 = vpop.f32.mrb[2].mxu1 }
 0x146   : > { %v842_v54 = vpop.f32.mrb[3].mxu1 }
 0x14d   : > { %v2351_v59 = vpop.f32.mrb[0].mxu0 }
 0x14e   : > { %v2359_v18 = vadd.f32 %v2351_v59, %v2301_v36  ;;  %v1754_v6 = vpop.f32.mrb[1].mxu0 }
 0x14f   : > { %v2360_v60 = vadd.f32 %v1754_v6, %v839_v57  ;;  %v2352_v62 = vpop.f32.mrb[2].mxu0 }
 0x150   : > { %v1803_v28 = vadd.f32 %v2359_v18, %v1795_v5  ;;  %v2361_v7 = vadd.f32 %v2352_v62, %v2302_v53  ;;  %v1757_v58 = vpop.f32.mrb[3].mxu0 }
 0x151   : > { %v1801_v12 = vadd.f32 %v2360_v60, %v1793_v14  ;;  %v2362_v13 = vadd.f32 %v1757_v58, %v842_v54 }
 0x152   : > { %1811 = vst.msk [vmem:[#allocation2 + $0x10] sm:$0xff] %vm409_vm3, %v1803_v28  ;;  %v1804_v16 = vadd.f32 %v2361_v7, %v1796_v0 }
 0x153   : > { %1809 = vst.msk [vmem:[#allocation2] sm:$0xff] %vm409_vm3, %v1801_v12  ;;  %v1802_v47 = vadd.f32 %v2362_v13, %v1794_v9 }
 0x154   : > { %1812 = vst.msk [vmem:[#allocation2 + $0x18] sm:$0xff] %vm409_vm3, %v1804_v16 }
 0x155   : > { %1810 = vst.msk [vmem:[#allocation2 + $0x8] sm:$0xff] %vm409_vm3, %v1802_v47  ;;  %v2355_v63 = vpop.f32.mrb[4].mxu0 }
 0x156   : > { %v1770_v19 = vpop.f32.mrb[5].mxu0 }
 0x157   : > { %v2315_v10 = vpop.f32.mrb[4].mxu1  ;;  %v2356_v51 = vpop.f32.mrb[6].mxu0 }
 0x158   : > { %v2363_v20 = vadd.f32 %v2355_v63, %v2315_v10  ;;  %v1089_v41 = vpop.f32.mrb[5].mxu1  ;;  %v1773_v27 = vpop.f32.mrb[7].mxu0 }
 0x159   : > { %v2364_v21 = vadd.f32 %v1770_v19, %v1089_v41  ;;  %v2316_v23 = vpop.f32.mrb[6].mxu1  ;;  %1820 = sbr.rel (%p2202_p11) target bundleno = 366 (0x16e), region = 40  ;;  %v1823_v61 = vld [vmem:[#allocation2 + $0x10] sm:$0xff] (!%p2202_p11) }
 0x15a   : > { %v1807_v26 = vadd.f32 %v2363_v20, %v1799_v15  ;;  %v2365_v22 = vadd.f32 %v2356_v51, %v2316_v23  ;;  %v1092_v45 = vpop.f32.mrb[7].mxu1  ;;  %v1821_v17 = vld [vmem:[#allocation2] sm:$0xff] (!%p2202_p11)  ;;  %v1838_v1 = vadd.f32 (!%p2202_p11), %v2203_v39, %v1823_v61 }
 0x15b   : > { %v1805_v48 = vadd.f32 %v2364_v21, %v1797_v46  ;;  %v2366_v2 = vadd.f32 %v1773_v27, %v1092_v45  ;;  %v1836_v31 = vadd.f32 (!%p2202_p11), %v2203_v39, %v1821_v17  ;;  %v1824_v8 = vld [vmem:[#allocation2 + $0x18] sm:$0xff] (!%p2202_p11) }
 0x15c   : > { %1815 = vst.msk [vmem:[#allocation2 + $0x30] sm:$0xff] %vm409_vm3, %v1807_v26  ;;  %v1808_v30 = vadd.f32 %v2365_v22, %v1800_v24  ;;  %v1822_v25 = vld [vmem:[#allocation2 + $0x8] sm:$0xff] (!%p2202_p11)  ;;  %v1839_v55 = vadd.f32 (!%p2202_p11), %v2203_v39, %v1824_v8  ;;  %v1846_v33 = vmax.f32 (!%p2202_p11), %v1838_v1, 0.0 }
 0x15d   : > { %1813 = vst.msk [vmem:[#allocation2 + $0x20] sm:$0xff] %vm409_vm3, %v1805_v48  ;;  %v1806_v34 = vadd.f32 %v2366_v2, %v1798_v29  ;;  %v1837_v56 = vadd.f32 (!%p2202_p11), %v2203_v39, %v1822_v25  ;;  %v1844_v11 = vmax.f32 (!%p2202_p11), %v1836_v31, 0.0 }
 0x15e   : > { %1816 = vst.msk [vmem:[#allocation2 + $0x38] sm:$0xff] %vm409_vm3, %v1808_v30  ;;  %v1847_v37 = vmax.f32 (!%p2202_p11), %v1839_v55, 0.0  ;;  %v2216_v53 = vpack.c.bf16 (!%p2202_p11), %v1846_v33, %v1846_v33 }
 0x15f   : > { %1814 = vst.msk [vmem:[#allocation2 + $0x28] sm:$0xff] %vm409_vm3, %v1806_v34  ;;  %v1845_v44 = vmax.f32 (!%p2202_p11), %v1837_v56, 0.0  ;;  %v2214_v40 = vpack.c.bf16 (!%p2202_p11), %v1844_v11, %v1844_v11 }
 0x160   : > { %v2217_v54 = vpack.c.bf16 %v1847_v37, %v1847_v37  ;;  %1887 = vst.msk [vmem:[%s2646_s24 + $0x8] sm:$0xf] %vm1884_vm8, %v2216_v53 }
 0x161   : > { %v2215_v42 = vpack.c.bf16 %v1845_v44, %v1845_v44  ;;  %1885 = vst.msk [vmem:[%s2646_s24] sm:$0xf] %vm1884_vm8, %v2214_v40 }
 0x162   : > { %1888 = vst.msk [vmem:[%s2646_s24 + $0xc] sm:$0xf] %vm1884_vm8, %v2217_v54 }
 0x163   : > { %v1827_v49 = vld [vmem:[#allocation2 + $0x30] sm:$0xff]  ;;  %1886 = vst.msk [vmem:[%s2646_s24 + $0x4] sm:$0xf] %vm1884_vm8, %v2215_v42 }
 0x164   : > { %v1825_v50 = vld [vmem:[#allocation2 + $0x20] sm:$0xff]  ;;  %v1842_v4 = vadd.f32 %v2203_v39, %v1827_v49 }
 0x165   : > { %v1840_v43 = vadd.f32 %v2203_v39, %v1825_v50  ;;  %v1828_v35 = vld [vmem:[#allocation2 + $0x38] sm:$0xff] }
 0x166   : > { %v1826_v32 = vld [vmem:[#allocation2 + $0x28] sm:$0xff]  ;;  %v1843_v38 = vadd.f32 %v2203_v39, %v1828_v35  ;;  %v1850_v57 = vmax.f32 %v1842_v4, 0.0 }
 0x167   : > { %v1841_v3 = vadd.f32 %v2203_v39, %v1826_v32  ;;  %v1848_v52 = vmax.f32 %v1840_v43, 0.0 }
 0x168   : > { %v1851_v5 = vmax.f32 %v1843_v38, 0.0  ;;  %v2220_v6 = vpack.c.bf16 %v1850_v57, %v1850_v57 }
 0x169   : > { %v1849_v36 = vmax.f32 %v1841_v3, 0.0  ;;  %v2218_v59 = vpack.c.bf16 %v1848_v52, %v1848_v52 }
 0x16a   : > { %v2221_v14 = vpack.c.bf16 %v1851_v5, %v1851_v5  ;;  %1891 = vst.msk [vmem:[%s2646_s24 + $0x18] sm:$0xf] %vm1884_vm8, %v2220_v6 }
 0x16b   : > { %v2219_v18 = vpack.c.bf16 %v1849_v36, %v1849_v36  ;;  %1889 = vst.msk [vmem:[%s2646_s24 + $0x10] sm:$0xf] %vm1884_vm8, %v2218_v59 }
 0x16c   : > { %1892 = vst.msk [vmem:[%s2646_s24 + $0x1c] sm:$0xf] %vm1884_vm8, %v2221_v14 }
 0x16d   : > { %1890 = vst.msk [vmem:[%s2646_s24 + $0x14] sm:$0xf] %vm1884_vm8, %v2219_v18 }
 0x16e PF: > { %s13_s18 = sadd.s32 1, %s2558_s18   ;;  %s3143_s12 = smov %s2546_s15 }
 0x16f   : > { %p10_p12 = scmp.ge.s32.totalorder %s13_s18, 50   ;;  %s3144_s13 = smov %s2550_s16 }
 0x170   : > { %s3145_s14 = smov %s2554_s17  ;;  %s3146_s15 = smov %s3150_s19 }
 0x171   : > { %s3147_s16 = smov %s3154_s20  ;;  %s3148_s17 = smov %s3158_s21 }
 0x172   :  { %12 = sbr.rel (!%p10_p12) target bundleno = 4 (0x4), region = 83 }

// kernel: dase_basic_block.5
= control target key start
LH: loop header
LB: loop body
LE: loop exit
PB: predicated region body
PF: predicated region fallthrough
CT: control target
= control target key end

     0   :  { %s621_s12 = smov 0   ;;  %s623_s13 = smov 0   ;;  %s695_s0 = inlined_call_operand.vmem [shape: f32[2,8,8,128], index: 0, kind: input, shape index: {}]   ;;  %s696_s1 = inlined_call_operand.vmem [shape: f32[2,8,8,128], index: 1, kind: input, shape index: {}]   ;;  %s697_s2 = inlined_call_operand.vmem [shape: f32[2,8,128], index: 2, kind: input, shape index: {}]   ;;  %s698_s3 = inlined_call_operand.vmem [shape: f32[2,8,8,128], index: 3, kind: output, shape index: {}]  }
   0x1   :  { %s625_s14 = smov 0  }
   0x2 LB: > { %s25_s15 = sadd.s32 1, %s594_s13  ;;  %p537_p0 = scmp.ge.s32.totalorder %s598_s14, 1  ;;  %s598_s14 = sphi %s625_s14, %s13_s14   ;;  %s594_s13 = sphi %s623_s13, %s700_s13   ;;  %s590_s12 = sphi %s621_s12, %s699_s12  }
   0x3   : > { %p27_p1 = scmp.ge.s32.totalorder %s25_s15, 2  ;;  %p189_p2 = scmp.lt.s32.totalorder %s598_s14, 3 }
   0x5   : > { %s702_s15 = smov (%p27_p1, %s25_s15), 0  ;;  %p190_p3 = pnand %p537_p0, %p189_p2 }
   0x6   : > { %p238_p4 = scmp.lt.s32.totalorder (!%p190_p3), %s590_s12, 1  ;;  %v288_v0 = vlaneseq (!%p190_p3)  ;;  %v600_v1 = vmov (!%p190_p3), 1966171168  }
   0x7   : > { %193 = sbr.rel (%p190_p3) target bundleno = 38 (0x26), region = 32  ;;  %v286_v2 = vunpack.c.l.s4 (!%p190_p3), %v600_v1 }
   0x8   : > { %v289_v3 = vshrl.u32 (!%p190_p3), %v288_v0, 7 }
   0x9   : > { %v287_v4 = vunpack.c.0.s8 (!%p190_p3), %v286_v2 }
   0xa   : > { %v335_v8 = vsub.s32 (!%p190_p3), 0, %v289_v3 }
   0xb   : > { %v290_v5 = vsub.s32 (!%p190_p3), %v287_v4, %v289_v3 }
   0xe   : > { %s704_s12 = smov (!%p238_p4, %s590_s12), 1 }
   0xf   : > { %s542_s16 = sshll.u32 %s704_s12, 3  ;;  %s639_s17 = sshll.u32 %s704_s12, 6 }
  0x10   : > { %s263_s20 = scalar_lea.vmem %s697_s2, %s542_s16  ;;  %s648_s23 = scalar_lea.vmem %s695_s0, %s639_s17 }
  0x11   : > { %v282_v6 = vld [vmem:[%s263_s20] sm:$0xff]  ;;  %s654_s26 = scalar_lea.vmem %s696_s1, %s639_s17  ;;  %v275_v19 = vld [vmem:[%s648_s23 + $0x8] sm:$0xff]  ;;  %v276_v20 = vld [vmem:[%s648_s23 + $0x10] sm:$0xff]  ;;  %s671_s29 = scalar_lea.vmem %s698_s3, %s639_s17 }
  0x12   : > { %v291_v7 = vrot.slane %v282_v6, %v290_v5  ;;  %v284_v9 = vcombine.high %v282_v6, %v282_v6  ;;  %v274_v13 = vld [vmem:[%s648_s23] sm:$0xff]  ;;  %v382_v27 = vld [vmem:[%s654_s26 + $0x8] sm:$0xff]  ;;  %v383_v28 = vld [vmem:[%s654_s26 + $0x10] sm:$0xff] }
  0x13   : > { %v381_v18 = vld [vmem:[%s654_s26] sm:$0xff]  ;;  %v277_v29 = vld [vmem:[%s648_s23 + $0x18] sm:$0xff]  ;;  %v279_v38 = vld [vmem:[%s648_s23 + $0x28] sm:$0xff] }
  0x14   : > { %v307_v10 = vrot.slane %v291_v7, %v290_v5  ;;  %v299_v11 = vcombine.high %v291_v7, %v291_v7  ;;  %v298_v12 = vrot.slane %v284_v9, %v290_v5  ;;  %v278_v26 = vld [vmem:[%s648_s23 + $0x20] sm:$0xff]  ;;  %v280_v39 = vld [vmem:[%s648_s23 + $0x30] sm:$0xff]  ;;  %v384_v40 = vld [vmem:[%s654_s26 + $0x18] sm:$0xff] }
  0x15   : > { %v385_v37 = vld [vmem:[%s654_s26 + $0x20] sm:$0xff]  ;;  %v386_v49 = vld [vmem:[%s654_s26 + $0x28] sm:$0xff]  ;;  %v387_v50 = vld [vmem:[%s654_s26 + $0x30] sm:$0xff] }
  0x16   : > { %v336_v14 = vrot.slane %v307_v10, %v335_v8  ;;  %v321_v15 = vrot.slane %v299_v11, %v290_v5  ;;  %v329_v16 = vcombine.high %v307_v10, %v307_v10  ;;  %v314_v17 = vrot.slane %v298_v12, %v290_v5  ;;  %v281_v51 = vld [vmem:[%s648_s23 + $0x38] sm:$0xff] }
  0x17   : > { %v300_v21 = vcombine.high %v298_v12, %v298_v12  ;;  %v388_v59 = vld [vmem:[%s654_s26 + $0x38] sm:$0xff] }
  0x18   : > { %v373_v22 = vmul.f32 %v336_v14, %v274_v13  ;;  %v340_v23 = vrot.slane %v321_v15, %v335_v8  ;;  %v344_v24 = vrot.slane %v329_v16, %v335_v8  ;;  %v331_v25 = vcombine.high %v321_v15, %v321_v15 }
  0x19   : > { %v352_v30 = vrot.slane %v314_v17, %v335_v8  ;;  %v328_v31 = vrot.slane %v300_v21, %v290_v5  ;;  %v330_v32 = vcombine.high %v314_v17, %v314_v17 }
  0x1a   : > { %v389_v33 = vadd.f32 %v381_v18, %v373_v22  ;;  %v374_v34 = vmul.f32 %v340_v23, %v275_v19  ;;  %v375_v35 = vmul.f32 %v344_v24, %v276_v20  ;;  %v348_v36 = vrot.slane %v331_v25, %v335_v8 }
  0x1b   : > { %v377_v41 = vmul.f32 %v352_v30, %v278_v26  ;;  %v356_v42 = vrot.slane %v328_v31, %v335_v8  ;;  %v360_v43 = vrot.slane %v330_v32, %v335_v8  ;;  %v332_v44 = vcombine.high %v328_v31, %v328_v31 }
  0x1c   : > { %v397_v45 = vmax.f32 %v389_v33, 0.0  ;;  %v390_v46 = vadd.f32 %v382_v27, %v374_v34  ;;  %v391_v47 = vadd.f32 %v383_v28, %v375_v35  ;;  %v376_v48 = vmul.f32 %v348_v36, %v277_v29 }
  0x1d   : > { %v393_v52 = vadd.f32 %v385_v37, %v377_v41  ;;  %v378_v53 = vmul.f32 %v356_v42, %v279_v38  ;;  %v379_v54 = vmul.f32 %v360_v43, %v280_v39  ;;  %v364_v55 = vrot.slane %v332_v44, %v335_v8 }
  0x1e   : > { %405 = vst [vmem:[%s671_s29] sm:$0xff] %v397_v45  ;;  %v398_v56 = vmax.f32 %v390_v46, 0.0  ;;  %v399_v57 = vmax.f32 %v391_v47, 0.0  ;;  %v392_v58 = vadd.f32 %v384_v40, %v376_v48 }
  0x1f   : > { %v401_v60 = vmax.f32 %v393_v52, 0.0  ;;  %v394_v61 = vadd.f32 %v386_v49, %v378_v53  ;;  %v395_v62 = vadd.f32 %v387_v50, %v379_v54  ;;  %v380_v63 = vmul.f32 %v364_v55, %v281_v51 }
  0x20   : > { %406 = vst [vmem:[%s671_s29 + $0x8] sm:$0xff] %v398_v56  ;;  %407 = vst [vmem:[%s671_s29 + $0x10] sm:$0xff] %v399_v57  ;;  %v400_v0 = vmax.f32 %v392_v58, 0.0 }
  0x21   : > { %409 = vst [vmem:[%s671_s29 + $0x20] sm:$0xff] %v401_v60  ;;  %v402_v1 = vmax.f32 %v394_v61, 0.0  ;;  %v403_v2 = vmax.f32 %v395_v62, 0.0  ;;  %v396_v3 = vadd.f32 %v388_v59, %v380_v63 }
  0x22   : > { %408 = vst [vmem:[%s671_s29 + $0x18] sm:$0xff] %v400_v0 }
  0x23   : > { %410 = vst [vmem:[%s671_s29 + $0x28] sm:$0xff] %v402_v1  ;;  %411 = vst [vmem:[%s671_s29 + $0x30] sm:$0xff] %v403_v2  ;;  %v404_v4 = vmax.f32 %v396_v3, 0.0 }
  0x25   : > { %412 = vst [vmem:[%s671_s29 + $0x38] sm:$0xff] %v404_v4 }
  0x26 PF: > { %s13_s14 = sadd.s32 1, %s598_s14   ;;  %s699_s12 = smov %s594_s13 }
  0x27   : > { %p10_p5 = scmp.ge.s32.totalorder %s13_s14, 4   ;;  %s700_s13 = smov %s702_s15 }
  0x29   :  { %12 = sbr.rel (!%p10_p5) target bundleno = 2 (0x2), region = 68 }

</bundles_post_ra>
